<compile_context>
chip_gen: v7x
topology: tpu7x:2x2x1
jax: 0.10.0
libtpu: 0.0.40
codegen_flags: <defaults>
</compile_context>

<pallas_src>
import math
from functools import partial

import jax
import jax.numpy as jnp
from jax.experimental import pallas as pl
from jax.experimental.pallas import tpu as pltpu

BN_EPS = 1e-5
NUM_CLASSES = 1000          # default ResNet50Customized path keeps torchvision's fc
MXU_TM = 256                # GEMM M-tile cap
MXU_TN = 256                # GEMM N-tile cap
MXU_TK = 1024               # GEMM K-tile cap
EW_TM = 512                 # elementwise row-tile cap
EW_TC = 512                 # elementwise channel-tile cap


# --------------------------------------------------------------------------- #
# tiling helpers
# --------------------------------------------------------------------------- #
def _round_up(x, m):
    return (x + m - 1) // m * m


def _divisor_tile(n, cap, quantum):
    """Largest multiple of `quantum` dividing n and <= cap (0 if none)."""
    best = 0
    for d in range(quantum, min(n, cap) + 1, quantum):
        if n % d == 0:
            best = d
    return best


def _m_tiling(m, cap):
    t = _divisor_tile(m, cap, 8)
    if t:
        return m, t
    mp = _round_up(m, 8)
    return mp, (_divisor_tile(mp, cap, 8) or min(mp, cap))


def _n_tile(n):
    if n <= 128:
        return n
    return _divisor_tile(n, MXU_TN, 128) or n


def _k_tile(k):
    if k <= MXU_TK:
        return k
    return _divisor_tile(k, MXU_TK, 128) or k


# --------------------------------------------------------------------------- #
# Pallas GEMM kernels
# --------------------------------------------------------------------------- #
def _gemm_stats_kernel(a_ref, b_ref, o_ref, stats_ref, acc_ref):
    """bf16 A @ bf16 B with f32 accumulation; bf16 output tile; also emits the
    per-M-tile channel sum / sum-of-squares (rows 0/1 of an (8, TN) block) so BN
    batch statistics need no extra pass over the conv output."""
    k = pl.program_id(2)

    @pl.when(k == 0)
    def _():
        acc_ref[...] = jnp.zeros_like(acc_ref)

    acc_ref[...] += jnp.dot(a_ref[...], b_ref[...],
                            preferred_element_type=jnp.float32)

    @pl.when(k == pl.num_programs(2) - 1)
    def _():
        acc = acc_ref[...]
        o_ref[...] = acc.astype(o_ref.dtype)
        stats_ref[...] = jnp.zeros_like(stats_ref)
        stats_ref[0:1, :] = jnp.sum(acc, axis=0, keepdims=True)
        stats_ref[1:2, :] = jnp.sum(acc * acc, axis=0, keepdims=True)


def _gemm_bias_kernel(a_ref, b_ref, bias_ref, o_ref):
    """fc GEMM: accumulate directly into the resident f32 output block."""
    k = pl.program_id(2)

    @pl.when(k == 0)
    def _():
        o_ref[...] = jnp.zeros_like(o_ref)

    o_ref[...] += jnp.dot(a_ref[...], b_ref[...],
                          preferred_element_type=jnp.float32)

    @pl.when(k == pl.num_programs(2) - 1)
    def _():
        o_ref[...] += bias_ref[...]


def _conv_gemm(a, w):
    """a: (M, K) bf16, w: (K, N) bf16 -> (out (M, N) bf16, ch_sum (N,), ch_ssq (N,))."""
    M, K = a.shape
    N = w.shape[1]
    Mp, TM = _m_tiling(M, MXU_TM)
    TK = _k_tile(K)
    TN = _n_tile(N)
    if Mp != M:                                  # only tiny tail cases get padded
        a = jnp.pad(a, ((0, Mp - M), (0, 0)))
    grid_m, grid_n, grid_k = Mp // TM, N // TN, K // TK
    out, stats = pl.pallas_call(
        _gemm_stats_kernel,
        out_shape=(jax.ShapeDtypeStruct((Mp, N), jnp.bfloat16),
                   jax.ShapeDtypeStruct((grid_m * 8, N), jnp.float32)),
        grid_spec=pltpu.PrefetchScalarGridSpec(
            num_scalar_prefetch=0,
            grid=(grid_m, grid_n, grid_k),
            in_specs=[pl.BlockSpec((TM, TK), lambda i, j, k: (i, k)),
                      pl.BlockSpec((TK, TN), lambda i, j, k: (k, j))],
            out_specs=[pl.BlockSpec((TM, TN), lambda i, j, k: (i, j)),
                       pl.BlockSpec((8, TN), lambda i, j, k: (i, j))],
            scratch_shapes=[pltpu.VMEM((TM, TN), jnp.float32)]),
        compiler_params=pltpu.CompilerParams(
            dimension_semantics=("parallel", "parallel", "arbitrary")),
    )(a, w)
    s = stats.reshape(grid_m, 8, N)
    return out[:M], jnp.sum(s[:, 0, :], axis=0), jnp.sum(s[:, 1, :], axis=0)


def _matmul_bias(a, w, bias):
    """a (M, K) bf16, w (K, N) bf16 (N pre-padded to lane multiple), bias (N,) f32."""
    M, K = a.shape
    N = w.shape[1]
    Mp, TM = _m_tiling(M, MXU_TM)
    TK = _k_tile(K)
    TN = _n_tile(N)
    if Mp != M:
        a = jnp.pad(a, ((0, Mp - M), (0, 0)))
    out = pl.pallas_call(
        _gemm_bias_kernel,
        out_shape=jax.ShapeDtypeStruct((Mp, N), jnp.float32),
        grid_spec=pltpu.PrefetchScalarGridSpec(
            num_scalar_prefetch=0,
            grid=(Mp // TM, N // TN, K // TK),
            in_specs=[pl.BlockSpec((TM, TK), lambda i, j, k: (i, k)),
                      pl.BlockSpec((TK, TN), lambda i, j, k: (k, j)),
                      pl.BlockSpec((1, TN), lambda i, j, k: (0, j))],
            out_specs=pl.BlockSpec((TM, TN), lambda i, j, k: (i, j))),
        compiler_params=pltpu.CompilerParams(
            dimension_semantics=("parallel", "parallel", "arbitrary")),
    )(a, w, bias.reshape(1, N))
    return out[:M]


# --------------------------------------------------------------------------- #
# Fused BN-affine (+ReLU)(+residual) — tiled elementwise Pallas kernels
# --------------------------------------------------------------------------- #
def _affine_kernel(x_ref, s_ref, b_ref, o_ref, *, relu):
    y = x_ref[...].astype(jnp.float32) * s_ref[...] + b_ref[...]
    if relu:
        y = jnp.maximum(y, 0.0)
    o_ref[...] = y.astype(o_ref.dtype)


def _affine_add_relu_kernel(x_ref, s_ref, b_ref, r_ref, o_ref):
    y = (x_ref[...].astype(jnp.float32) * s_ref[...] + b_ref[...]
         + r_ref[...].astype(jnp.float32))
    o_ref[...] = jnp.maximum(y, 0.0).astype(o_ref.dtype)


def _bn_affine_apply(x2, scale, shift, residual2, relu):
    """x2 (M, C) bf16; scale/shift (C,) f32; optional residual2 (M, C) bf16."""
    M, C = x2.shape
    Mp, TR = _m_tiling(M, EW_TM)
    TC = C if C <= EW_TC else EW_TC
    if Mp != M:
        x2 = jnp.pad(x2, ((0, Mp - M), (0, 0)))
        if residual2 is not None:
            residual2 = jnp.pad(residual2, ((0, Mp - M), (0, 0)))
    s = scale.reshape(1, C).astype(jnp.float32)
    b = shift.reshape(1, C).astype(jnp.float32)
    xspec = pl.BlockSpec((TR, TC), lambda i, j: (i, j))
    vspec = pl.BlockSpec((1, TC), lambda i, j: (0, j))
    grid = (Mp // TR, C // TC)
    cparams = pltpu.CompilerParams(dimension_semantics=("parallel", "parallel"))
    if residual2 is not None:
        out = pl.pallas_call(
            _affine_add_relu_kernel,
            out_shape=jax.ShapeDtypeStruct((Mp, C), jnp.bfloat16),
            grid=grid,
            in_specs=[xspec, vspec, vspec, xspec],
            out_specs=xspec,
            compiler_params=cparams,
        )(x2, s, b, residual2)
    else:
        out = pl.pallas_call(
            partial(_affine_kernel, relu=relu),
            out_shape=jax.ShapeDtypeStruct((Mp, C), jnp.bfloat16),
            grid=grid,
            in_specs=[xspec, vspec, vspec],
            out_specs=xspec,
            compiler_params=cparams,
        )(x2, s, b)
    return out[:M]


# --------------------------------------------------------------------------- #
# Conv (GEMM with fused BN stats) + BN affine
# --------------------------------------------------------------------------- #
@partial(jax.jit, static_argnames=("kh", "kw", "stride", "padding", "relu"))
def conv_bn(x, w_gemm, gamma, beta, residual, kh, kw, stride, padding, relu):
    """Convolution (Pallas MXU GEMM, BN stats fused in the epilogue) followed by a
    training-mode BatchNorm affine (+optional residual add, +optional ReLU)."""
    N, H, W, Cin = x.shape
    Cout = w_gemm.shape[1]
    Ho = (H + 2 * padding - kh) // stride + 1
    Wo = (W + 2 * padding - kw) // stride + 1
    M = N * Ho * Wo

    if kh == 1 and kw == 1 and padding == 0:
        xs = x if stride == 1 else x[:, ::stride, ::stride, :]
        a = xs.reshape(M, Cin)                              # no im2col copy
    else:
        # TODO(synk): kh>1 convs still materialize a (now bf16) im2col patch matrix;
        # the halo'd / strided input windows of an implicit-im2col GEMM are not
        # expressible with static Blocked BlockSpecs (would need a manual-DMA kernel).
        xp = jnp.pad(x, ((0, 0), (padding, padding), (padding, padding), (0, 0)))
        taps = []
        for i in range(kh):
            for j in range(kw):
                taps.append(xp[:, i:i + stride * Ho:stride,
                               j:j + stride * Wo:stride, :])
        a = jnp.concatenate(taps, axis=-1).reshape(M, kh * kw * Cin)

    y2, ch_sum, ch_ssq = _conv_gemm(a, w_gemm)

    inv_m = 1.0 / float(M)
    mean = ch_sum * inv_m
    var = jnp.maximum(ch_ssq * inv_m - mean * mean, 0.0)    # biased training-mode var
    scale = gamma * jax.lax.rsqrt(var + BN_EPS)
    shift = beta - mean * scale

    r2 = residual.reshape(M, Cout) if residual is not None else None
    y2 = _bn_affine_apply(y2, scale, shift, r2, relu)
    return y2.reshape(N, Ho, Wo, Cout)


# --------------------------------------------------------------------------- #
# Maxpool 3x3 / s2 / p1 and global average pool
# --------------------------------------------------------------------------- #
def _maxpool_kernel(u0_ref, u1_ref, u2_ref, o_ref):
    # u*: (1, Ho+1, 2, Wo, C) column-phase windows; the pair-split rows express the
    # stride-2 row window with plain leading-dim slices (no strided in-kernel ops).
    w = jnp.maximum(jnp.maximum(u0_ref[0], u1_ref[0]), u2_ref[0])
    o_ref[0] = jnp.maximum(jnp.maximum(w[:-1, 0], w[:-1, 1]), w[1:, 0])


@jax.jit
def maxpool_3x3_s2_p1(x):
    N, H, W, C = x.shape                       # H, W even
    Ho, Wo = H // 2, W // 2
    xp = jnp.pad(x, ((0, 0), (1, 1), (1, 1), (0, 0)),
                 constant_values=-jnp.inf)
    # three column phases (strided slices ~1.5x input traffic, not a 9x stack),
    # rows reshaped into (pair, 2) — a free view.
    us = [xp[:, :, d:d + 2 * Wo:2, :].reshape(N, Ho + 1, 2, Wo, C)
          for d in range(3)]
    in_spec = pl.BlockSpec((1, Ho + 1, 2, Wo, C), lambda n: (n, 0, 0, 0, 0))
    return pl.pallas_call(
        _maxpool_kernel,
        out_shape=jax.ShapeDtypeStruct((N, Ho, Wo, C), x.dtype),
        grid=(N,),
        in_specs=[in_spec, in_spec, in_spec],
        out_specs=pl.BlockSpec((1, Ho, Wo, C), lambda n: (n, 0, 0, 0)),
        compiler_params=pltpu.CompilerParams(dimension_semantics=("parallel",)),
    )(*us)


def _gap_kernel(x_ref, o_ref):
    o_ref[0] = jnp.mean(x_ref[0].astype(jnp.float32), axis=0, keepdims=True)


@jax.jit
def global_avgpool(x):
    N, H, W, C = x.shape
    x3 = x.reshape(N, H * W, C)
    out = pl.pallas_call(
        _gap_kernel,
        out_shape=jax.ShapeDtypeStruct((N, 1, C), jnp.float32),
        grid=(N,),
        in_specs=[pl.BlockSpec((1, H * W, C), lambda n: (n, 0, 0))],
        out_specs=pl.BlockSpec((1, 1, C), lambda n: (n, 0, 0)),
        compiler_params=pltpu.CompilerParams(dimension_semantics=("parallel",)),
    )(x3)
    return out[:, 0, :]


@jax.jit
def fc_head(feat, w, b):
    return _matmul_bias(feat.astype(jnp.bfloat16), w, b)


# --------------------------------------------------------------------------- #
# ResNet-50 parameters (matching ResNet50Customized._initialize_weights), bf16 GEMM
# weights stored pre-reshaped / pre-padded so no per-call weight padding is needed.
# --------------------------------------------------------------------------- #
def init_resnet50_params(key, num_fc_out=NUM_CLASSES):
    keys = jax.random.split(key, 256)
    it = iter(range(256))

    def conv_w(cin, cout, kh, kw, cin_pad=None):
        # kaiming_normal_(mode='fan_out', nonlinearity='relu'), no conv bias.
        std = math.sqrt(2.0 / (cout * kh * kw))
        w = std * jax.random.normal(keys[next(it)], (kh, kw, cin, cout), jnp.float32)
        if cin_pad is not None and cin_pad > cin:
            w = jnp.pad(w, ((0, 0), (0, 0), (0, cin_pad - cin), (0, 0)))
            cin = cin_pad
        return w.reshape(kh * kw * cin, cout).astype(jnp.bfloat16)

    def bn_p(c):
        # BatchNorm2d keeps its default init (weight=1, bias=0); _initialize_weights
        # only overrides BatchNorm1d.
        return jnp.ones((c,), jnp.float32), jnp.zeros((c,), jnp.float32)

    params = {"conv1": conv_w(3, 64, 7, 7, cin_pad=8), "bn1": bn_p(64)}

    layer_cfg = [(64, 3), (128, 4), (256, 6), (512, 3)]
    in_c = 64
    layers = []
    for li, (planes, nblocks) in enumerate(layer_cfg):
        blocks = []
        for b in range(nblocks):
            stride = 2 if (li > 0 and b == 0) else 1
            out_c = planes * 4
            blk = {
                "conv1": conv_w(in_c, planes, 1, 1), "bn1": bn_p(planes),
                "conv2": conv_w(planes, planes, 3, 3), "bn2": bn_p(planes),
                "conv3": conv_w(planes, out_c, 1, 1), "bn3": bn_p(out_c),
            }
            if stride != 1 or in_c != out_c:
                blk["down_conv"] = conv_w(in_c, out_c, 1, 1)
                blk["down_bn"] = bn_p(out_c)
            blocks.append(blk)
            in_c = out_c
        layers.append(blocks)
    params["layers"] = layers

    # default path keeps torchvision's 1000-way fc; re-init normal(0, 0.005), bias 0.
    n_pad = _round_up(num_fc_out, 128)
    fc_w = 0.005 * jax.random.normal(keys[next(it)], (2048, num_fc_out), jnp.float32)
    params["fc_w"] = jnp.pad(fc_w, ((0, 0), (0, n_pad - num_fc_out))).astype(jnp.bfloat16)
    params["fc_b"] = jnp.zeros((n_pad,), jnp.float32)
    return params


# --------------------------------------------------------------------------- #
# Forward pass
# --------------------------------------------------------------------------- #
def bottleneck(x, blk, stride):
    identity = x
    out = conv_bn(x, blk["conv1"], blk["bn1"][0], blk["bn1"][1], None,
                  kh=1, kw=1, stride=1, padding=0, relu=True)
    out = conv_bn(out, blk["conv2"], blk["bn2"][0], blk["bn2"][1], None,
                  kh=3, kw=3, stride=stride, padding=1, relu=True)
    if "down_conv" in blk:
        identity = conv_bn(x, blk["down_conv"], blk["down_bn"][0], blk["down_bn"][1],
                           None, kh=1, kw=1, stride=stride, padding=0, relu=False)
    return conv_bn(out, blk["conv3"], blk["bn3"][0], blk["bn3"][1], identity,
                   kh=1, kw=1, stride=1, padding=0, relu=True)


def resnet50_forward(params, x_nchw):
    x = jnp.transpose(x_nchw, (0, 2, 3, 1)).astype(jnp.bfloat16)   # NCHW -> NHWC
    x = jnp.pad(x, ((0, 0), (0, 0), (0, 0), (0, 5)))               # Cin 3 -> 8 (zero taps)
    x = conv_bn(x, params["conv1"], params["bn1"][0], params["bn1"][1], None,
                kh=7, kw=7, stride=2, padding=3, relu=True)
    x = maxpool_3x3_s2_p1(x)
    for li, blocks in enumerate(params["layers"]):
        for bi, blk in enumerate(blocks):
            stride = 2 if (li > 0 and bi == 0) else 1
            x = bottleneck(x, blk, stride)
    feat = global_avgpool(x)                                       # (N, 2048) f32
    logits = fc_head(feat, params["fc_w"], params["fc_b"])
    return logits[:, :NUM_CLASSES]


if __name__ == "__main__":
    key = jax.random.PRNGKey(0)
    k_param, k_in = jax.random.split(key)
    params = init_resnet50_params(k_param)
    # PyTorch conv inputs are NCHW; small example: batch=2, 3 channels, 32x32.
    x = jax.random.normal(k_in, (2, 3, 32, 32), jnp.float32)
    logits = resnet50_forward(params, x)
    logits = jax.block_until_ready(logits)
    assert logits.shape == (2, NUM_CLASSES), logits.shape
    assert bool(jnp.all(jnp.isfinite(logits)))
    print("KERNEL_OK")
</pallas_src>

<mosaic_0001>
module attributes {stable_mosaic.version = 11 : i64} {
  func.func @_gemm_stats_kernel(%arg0: i32, %arg1: i32, %arg2: i32, %arg3: memref<256x392xbf16, #tpu.memory_space<vmem>>, %arg4: memref<392x64xbf16, #tpu.memory_space<vmem>>, %arg5: memref<256x64xbf16, #tpu.memory_space<vmem>>, %arg6: memref<8x64xf32, #tpu.memory_space<vmem>>, %arg7: memref<256x64xf32, #tpu.memory_space<vmem>>) attributes {dimension_semantics = [#tpu.dimension_semantics<parallel>, #tpu.dimension_semantics<parallel>, #tpu.dimension_semantics<arbitrary>], iteration_bounds = array<i64: 2, 1, 1>, scalar_prefetch = 0 : i64, scratch_operands = 1 : i64, tpu.core_type = #tpu.core_type<tc>, window_params = [{transform_indices = @transform_0, window_bounds = array<i64: 256, 392>}, {transform_indices = @transform_1, window_bounds = array<i64: 392, 64>}, {transform_indices = @transform_2, window_bounds = array<i64: 256, 64>}, {transform_indices = @transform_3, window_bounds = array<i64: 8, 64>}]} {
    %c0_i32 = arith.constant 0 : i32
    %0 = arith.cmpi eq, %arg2, %c0_i32 : i32
    %1 = arith.extui %0 : i1 to i32
    %c0_i32_0 = arith.constant 0 : i32
    %2 = arith.cmpi ne, %1, %c0_i32_0 : i32
    scf.if %2 {
      %cst_10 = arith.constant 0.000000e+00 : f32
      %12 = vector.broadcast %cst_10 : f32 to vector<256x64xf32>
      %c0_11 = arith.constant 0 : index
      %c0_12 = arith.constant 0 : index
      %13 = vector.load %arg7[%c0_11, %c0_12] : memref<256x64xf32, #tpu.memory_space<vmem>>, vector<256x64xf32>
      tpu.vector_store %arg7[%c0_11, %c0_12], %12 {strides = array<i32>} : memref<256x64xf32, #tpu.memory_space<vmem>>, vector<256x64xf32>,
    } else {
    }
    %c0 = arith.constant 0 : index
    %c0_1 = arith.constant 0 : index
    %3 = vector.load %arg7[%c0, %c0_1] : memref<256x64xf32, #tpu.memory_space<vmem>>, vector<256x64xf32>
    %c0_2 = arith.constant 0 : index
    %c0_3 = arith.constant 0 : index
    %4 = vector.load %arg3[%c0_2, %c0_3] : memref<256x392xbf16, #tpu.memory_space<vmem>>, vector<256x392xbf16>
    %c0_4 = arith.constant 0 : index
    %c0_5 = arith.constant 0 : index
    %5 = vector.load %arg4[%c0_4, %c0_5] : memref<392x64xbf16, #tpu.memory_space<vmem>>, vector<392x64xbf16>
    %cst = arith.constant dense<0.000000e+00> : vector<256x64xf32>
    %6 = tpu.matmul %4, %5, %cst {dimension_numbers = #tpu.dot_dimension_numbers<[1], [0], [0], [1], [0, 0, 1, 1], [], []>} : vector<256x392xbf16>, vector<392x64xbf16>, vector<256x64xf32> -> vector<256x64xf32>
    %7 = arith.addf %3, %6 : vector<256x64xf32>
    %c0_6 = arith.constant 0 : index
    %c0_7 = arith.constant 0 : index
    %8 = vector.load %arg7[%c0_6, %c0_7] : memref<256x64xf32, #tpu.memory_space<vmem>>, vector<256x64xf32>
    tpu.vector_store %arg7[%c0_6, %c0_7], %7 {strides = array<i32>} : memref<256x64xf32, #tpu.memory_space<vmem>>, vector<256x64xf32>,
    %c0_i32_8 = arith.constant 0 : i32
    %9 = arith.cmpi eq, %arg2, %c0_i32_8 : i32
    %10 = arith.extui %9 : i1 to i32
    %c0_i32_9 = arith.constant 0 : i32
    %11 = arith.cmpi ne, %10, %c0_i32_9 : i32
    scf.if %11 {
      %c0_10 = arith.constant 0 : index
      %c0_11 = arith.constant 0 : index
      %12 = vector.load %arg7[%c0_10, %c0_11] : memref<256x64xf32, #tpu.memory_space<vmem>>, vector<256x64xf32>
      %13 = arith.truncf %12 : vector<256x64xf32> to vector<256x64xbf16>
      %c0_12 = arith.constant 0 : index
      %c0_13 = arith.constant 0 : index
      %14 = vector.load %arg5[%c0_12, %c0_13] : memref<256x64xbf16, #tpu.memory_space<vmem>>, vector<256x64xbf16>
      tpu.vector_store %arg5[%c0_12, %c0_13], %13 {strides = array<i32>} : memref<256x64xbf16, #tpu.memory_space<vmem>>, vector<256x64xbf16>,
      %cst_14 = arith.constant 0.000000e+00 : f32
      %15 = vector.broadcast %cst_14 : f32 to vector<8x64xf32>
      %c0_15 = arith.constant 0 : index
      %c0_16 = arith.constant 0 : index
      %16 = vector.load %arg6[%c0_15, %c0_16] : memref<8x64xf32, #tpu.memory_space<vmem>>, vector<8x64xf32>
      tpu.vector_store %arg6[%c0_15, %c0_16], %15 {strides = array<i32>} : memref<8x64xf32, #tpu.memory_space<vmem>>, vector<8x64xf32>,
      %cst_17 = arith.constant dense<0.000000e+00> : vector<64xf32>
      %17 = vector.multi_reduction <add>, %12, %cst_17 [0] : vector<256x64xf32> to vector<64xf32>
      %18 = vector.shape_cast %17 : vector<64xf32> to vector<1x64xf32>
      %c0_18 = arith.constant 0 : index
      %c0_19 = arith.constant 0 : index
      %19 = vector.load %arg6[%c0_18, %c0_19] : memref<8x64xf32, #tpu.memory_space<vmem>>, vector<1x64xf32>
      tpu.vector_store %arg6[%c0_18, %c0_19], %18 {strides = array<i32>} : memref<8x64xf32, #tpu.memory_space<vmem>>, vector<1x64xf32>,
      %20 = arith.mulf %12, %12 : vector<256x64xf32>
      %cst_20 = arith.constant dense<0.000000e+00> : vector<64xf32>
      %21 = vector.multi_reduction <add>, %20, %cst_20 [0] : vector<256x64xf32> to vector<64xf32>
      %22 = vector.shape_cast %21 : vector<64xf32> to vector<1x64xf32>
      %c1 = arith.constant 1 : index
      %c0_21 = arith.constant 0 : index
      %23 = vector.load %arg6[%c1, %c0_21] : memref<8x64xf32, #tpu.memory_space<vmem>>, vector<1x64xf32>
      tpu.vector_store %arg6[%c1, %c0_21], %22 {strides = array<i32>} : memref<8x64xf32, #tpu.memory_space<vmem>>, vector<1x64xf32>,
    } else {
    }
    return
  }
  func.func @transform_0(%arg0: i32, %arg1: i32, %arg2: i32) -> (i32, i32) {
    %c0_i32 = arith.constant 0 : i32
    return %arg0, %arg2 : i32, i32
  }
  func.func @transform_1(%arg0: i32, %arg1: i32, %arg2: i32) -> (i32, i32) {
    %c0_i32 = arith.constant 0 : i32
    return %arg2, %arg1 : i32, i32
  }
  func.func @transform_2(%arg0: i32, %arg1: i32, %arg2: i32) -> (i32, i32) {
    %c0_i32 = arith.constant 0 : i32
    return %arg0, %arg1 : i32, i32
  }
  func.func @transform_3(%arg0: i32, %arg1: i32, %arg2: i32) -> (i32, i32) {
    %c0_i32 = arith.constant 0 : i32
    return %arg0, %arg1 : i32, i32
  }
}

module attributes {stable_mosaic.version = 11 : i64} {
  func.func @_affine_kernel(%arg0: i32, %arg1: i32, %arg2: memref<512x64xbf16, #tpu.memory_space<vmem>>, %arg3: memref<1x64xf32, #tpu.memory_space<vmem>>, %arg4: memref<1x64xf32, #tpu.memory_space<vmem>>, %arg5: memref<512x64xbf16, #tpu.memory_space<vmem>>) attributes {dimension_semantics = [#tpu.dimension_semantics<parallel>, #tpu.dimension_semantics<parallel>], iteration_bounds = array<i64: 1, 1>, scalar_prefetch = 0 : i64, scratch_operands = 0 : i64, tpu.core_type = #tpu.core_type<tc>, window_params = [{transform_indices = @transform_0, window_bounds = array<i64: 512, 64>}, {transform_indices = @transform_1, window_bounds = array<i64: 1, 64>}, {transform_indices = @transform_2, window_bounds = array<i64: 1, 64>}, {transform_indices = @transform_3, window_bounds = array<i64: 512, 64>}]} {
    %c0 = arith.constant 0 : index
    %c0_0 = arith.constant 0 : index
    %0 = vector.load %arg2[%c0, %c0_0] : memref<512x64xbf16, #tpu.memory_space<vmem>>, vector<512x64xbf16>
    %1 = arith.extf %0 : vector<512x64xbf16> to vector<512x64xf32>
    %c0_1 = arith.constant 0 : index
    %c0_2 = arith.constant 0 : index
    %2 = vector.load %arg3[%c0_1, %c0_2] : memref<1x64xf32, #tpu.memory_space<vmem>>, vector<1x64xf32>
    %3 = vector.broadcast %2 : vector<1x64xf32> to vector<512x64xf32>
    %4 = arith.mulf %1, %3 : vector<512x64xf32>
    %c0_3 = arith.constant 0 : index
    %c0_4 = arith.constant 0 : index
    %5 = vector.load %arg4[%c0_3, %c0_4] : memref<1x64xf32, #tpu.memory_space<vmem>>, vector<1x64xf32>
    %6 = vector.broadcast %5 : vector<1x64xf32> to vector<512x64xf32>
    %7 = arith.addf %4, %6 : vector<512x64xf32>
    %cst = arith.constant 0.000000e+00 : f32
    %8 = vector.broadcast %cst : f32 to vector<512x64xf32>
    %9 = arith.maximumf %7, %8 : vector<512x64xf32>
    %10 = arith.truncf %9 : vector<512x64xf32> to vector<512x64xbf16>
    %c0_5 = arith.constant 0 : index
    %c0_6 = arith.constant 0 : index
    %11 = vector.load %arg5[%c0_5, %c0_6] : memref<512x64xbf16, #tpu.memory_space<vmem>>, vector<512x64xbf16>
    tpu.vector_store %arg5[%c0_5, %c0_6], %10 {strides = array<i32>} : memref<512x64xbf16, #tpu.memory_space<vmem>>, vector<512x64xbf16>,
    return
  }
  func.func @transform_0(%arg0: i32, %arg1: i32) -> (i32, i32) {
    %c0_i32 = arith.constant 0 : i32
    return %arg0, %arg1 : i32, i32
  }
  func.func @transform_1(%arg0: i32, %arg1: i32) -> (i32, i32) {
    %c0_i32 = arith.constant 0 : i32
    %c0_i32_0 = arith.constant 0 : i32
    return %c0_i32, %arg1 : i32, i32
  }
  func.func @transform_2(%arg0: i32, %arg1: i32) -> (i32, i32) {
    %c0_i32 = arith.constant 0 : i32
    %c0_i32_0 = arith.constant 0 : i32
    return %c0_i32, %arg1 : i32, i32
  }
  func.func @transform_3(%arg0: i32, %arg1: i32) -> (i32, i32) {
    %c0_i32 = arith.constant 0 : i32
    return %arg0, %arg1 : i32, i32
  }
}

</mosaic_0001>

<bundles_post_ra>
// kernel: conv_bn.3
= control target key start
LH: loop header
LB: loop body
LE: loop exit
PB: predicated region body
PF: predicated region fallthrough
CT: control target
= control target key end

     0   :  { %vm605_vm0 = vcmask 519168   ;;  %s1335_s0 = inlined_call_operand.vmem [shape: bf16[512,64], index: 0, kind: input, shape index: {}]   ;;  %s1336_s1 = inlined_call_operand.vmem [shape: f32[1,64], index: 1, kind: input, shape index: {}]   ;;  %s1337_s2 = inlined_call_operand.vmem [shape: f32[1,64], index: 2, kind: input, shape index: {}]   ;;  %s1338_s3 = inlined_call_operand.hbm [shape: bf16[512,64], index: 3, kind: output, shape index: {}]  }
   0x1   :  { %v817_v0 = vld [vmem:[%s1335_s0] sm:$0xff]   ;;  %v944_v4 = vld [vmem:[%s1335_s0 + $0x8] sm:$0xff]   ;;  %v945_v5 = vld [vmem:[%s1335_s0 + $0x10] sm:$0xff]  }
   0x2   :  { %v1031_v1 = vld [vmem:[%s1336_s1] ss:$0 sm:$0xff]  ;;  %v818_v2 = vunpack.c.l.bf16 %v817_v0  ;;  %v819_v3 = vunpack.c.h.bf16 %v817_v0  ;;  %v946_v6 = vld [vmem:[%s1335_s0 + $0x18] sm:$0xff]   ;;  %v822_v8 = vunpack.c.l.bf16 %v944_v4  ;;  %v823_v9 = vunpack.c.h.bf16 %v944_v4  ;;  %v948_v41 = vld [vmem:[%s1335_s0 + $0x28] sm:$0xff]  }
   0x3   :  { %v1045_v7 = vld [vmem:[%s1337_s2] ss:$0 sm:$0xff]  ;;  %v826_v10 = vunpack.c.l.bf16 %v945_v5  ;;  %v827_v11 = vunpack.c.h.bf16 %v945_v5  ;;  %v830_v14 = vunpack.c.l.bf16 %v946_v6  ;;  %v831_v15 = vunpack.c.h.bf16 %v946_v6  ;;  %v949_v42 = vld [vmem:[%s1335_s0 + $0x30] sm:$0xff]   ;;  %v950_v47 = vld [vmem:[%s1335_s0 + $0x38] sm:$0xff]  }
   0x4   :  { %v150_v12 = vmul.f32 %v818_v2, %v1031_v1  ;;  %v151_v13 = vmul.f32 %v819_v3, %v1031_v1  ;;  %v152_v16 = vmul.f32 %v822_v8, %v1031_v1  ;;  %v153_v17 = vmul.f32 %v823_v9, %v1031_v1  ;;  %v947_v36 = vld [vmem:[%s1335_s0 + $0x20] sm:$0xff]  }
   0x5   :  { %v154_v18 = vmul.f32 %v826_v10, %v1031_v1  ;;  %v155_v19 = vmul.f32 %v827_v11, %v1031_v1  ;;  %v156_v22 = vmul.f32 %v830_v14, %v1031_v1  ;;  %v157_v23 = vmul.f32 %v831_v15, %v1031_v1 }
   0x6   :  { %v221_v20 = vadd.f32 %v1045_v7, %v150_v12  ;;  %v222_v21 = vadd.f32 %v1045_v7, %v151_v13  ;;  %v223_v24 = vadd.f32 %v1045_v7, %v152_v16  ;;  %v224_v25 = vadd.f32 %v1045_v7, %v153_v17 }
   0x7   :  { %v225_v26 = vadd.f32 %v1045_v7, %v154_v18  ;;  %v226_v27 = vadd.f32 %v1045_v7, %v155_v19  ;;  %v227_v30 = vadd.f32 %v1045_v7, %v156_v22  ;;  %v228_v31 = vadd.f32 %v1045_v7, %v157_v23 }
   0x8   :  { %v285_v28 = vmax.f32 %v221_v20, 0.0  ;;  %v286_v29 = vmax.f32 %v222_v21, 0.0  ;;  %v287_v32 = vmax.f32 %v223_v24, 0.0  ;;  %v288_v33 = vmax.f32 %v224_v25, 0.0 }
   0x9   :  { %v289_v34 = vmax.f32 %v225_v26, 0.0  ;;  %v290_v35 = vmax.f32 %v226_v27, 0.0  ;;  %v291_v39 = vmax.f32 %v227_v30, 0.0  ;;  %v292_v40 = vmax.f32 %v228_v31, 0.0 }
   0xa   :  { %v752_v37 = vpack.c.bf16 %v285_v28, %v285_v28  ;;  %v753_v38 = vpack.c.bf16 %v286_v29, %v286_v29  ;;  %v754_v43 = vpack.c.bf16 %v287_v32, %v287_v32  ;;  %v755_v44 = vpack.c.bf16 %v288_v33, %v288_v33 }
   0xb   :  { %v756_v45 = vpack.c.bf16 %v289_v34, %v289_v34  ;;  %v757_v46 = vpack.c.bf16 %v290_v35, %v290_v35  ;;  %v758_v48 = vpack.c.bf16 %v291_v39, %v291_v39  ;;  %v759_v49 = vpack.c.bf16 %v292_v40, %v292_v40 }
   0xc   :  { %606 = vst.msk [vmem:[#allocation2] sm:$0xf] %vm605_vm0, %v752_v37  ;;  %607 = vst.msk [vmem:[#allocation2 + $0x4] sm:$0xf] %vm605_vm0, %v753_v38  ;;  %v834_v50 = vunpack.c.l.bf16 %v947_v36  ;;  %v835_v51 = vunpack.c.h.bf16 %v947_v36 }
   0xd   :  { %8 = vsyncpa [#allocation3], 0  ;;  %608 = vst.msk [vmem:[#allocation2 + $0x8] sm:$0xf] %vm605_vm0, %v754_v43  ;;  %v838_v52 = vunpack.c.l.bf16 %v948_v41  ;;  %v839_v53 = vunpack.c.h.bf16 %v948_v41  ;;  %v842_v54 = vunpack.c.l.bf16 %v949_v42  ;;  %v843_v55 = vunpack.c.h.bf16 %v949_v42  ;;  %v951_v18 = vld [vmem:[%s1335_s0 + $0x40] sm:$0xff]   ;;  %v952_v23 = vld [vmem:[%s1335_s0 + $0x48] sm:$0xff]  }
   0xe   :  { %609 = vst.msk [vmem:[#allocation2 + $0xc] sm:$0xf] %vm605_vm0, %v755_v44  ;;  %610 = vst.msk [vmem:[#allocation2 + $0x10] sm:$0xf] %vm605_vm0, %v756_v45  ;;  %v158_v56 = vmul.f32 %v834_v50, %v1031_v1  ;;  %v159_v57 = vmul.f32 %v835_v51, %v1031_v1  ;;  %v846_v58 = vunpack.c.l.bf16 %v950_v47  ;;  %v847_v59 = vunpack.c.h.bf16 %v950_v47  ;;  %v953_v24 = vld [vmem:[%s1335_s0 + $0x50] sm:$0xff]   ;;  %v954_v29 = vld [vmem:[%s1335_s0 + $0x58] sm:$0xff]  }
   0xf   :  { %611 = vst.msk [vmem:[#allocation2 + $0x14] sm:$0xf] %vm605_vm0, %v757_v46  ;;  %612 = vst.msk [vmem:[#allocation2 + $0x18] sm:$0xf] %vm605_vm0, %v758_v48  ;;  %v160_v60 = vmul.f32 %v838_v52, %v1031_v1  ;;  %v161_v61 = vmul.f32 %v839_v53, %v1031_v1  ;;  %v162_v62 = vmul.f32 %v842_v54, %v1031_v1  ;;  %v850_v32 = vunpack.c.l.bf16 %v951_v18 }
  0x10   :  { %613 = vst.msk [vmem:[#allocation2 + $0x1c] sm:$0xf] %vm605_vm0, %v759_v49  ;;  %v163_v63 = vmul.f32 %v843_v55, %v1031_v1  ;;  %v229_v0 = vadd.f32 %v1045_v7, %v158_v56  ;;  %v230_v2 = vadd.f32 %v1045_v7, %v159_v57  ;;  %v164_v3 = vmul.f32 %v846_v58, %v1031_v1 }
  0x11   :  { %v165_v4 = vmul.f32 %v847_v59, %v1031_v1  ;;  %v231_v5 = vadd.f32 %v1045_v7, %v160_v60  ;;  %v232_v6 = vadd.f32 %v1045_v7, %v161_v61  ;;  %v233_v8 = vadd.f32 %v1045_v7, %v162_v62  ;;  %v955_v62 = vld [vmem:[%s1335_s0 + $0x60] sm:$0xff]  }
  0x12   :  { %v234_v9 = vadd.f32 %v1045_v7, %v163_v63  ;;  %v293_v10 = vmax.f32 %v229_v0, 0.0  ;;  %v294_v11 = vmax.f32 %v230_v2, 0.0  ;;  %v235_v12 = vadd.f32 %v1045_v7, %v164_v3 }
  0x13   :  { %v236_v13 = vadd.f32 %v1045_v7, %v165_v4  ;;  %v295_v14 = vmax.f32 %v231_v5, 0.0  ;;  %v296_v15 = vmax.f32 %v232_v6, 0.0  ;;  %v297_v16 = vmax.f32 %v233_v8, 0.0  ;;  %v956_v4 = vld [vmem:[%s1335_s0 + $0x68] sm:$0xff]   ;;  %v957_v5 = vld [vmem:[%s1335_s0 + $0x70] sm:$0xff]  }
  0x14   :  { %v298_v17 = vmax.f32 %v234_v9, 0.0  ;;  %v760_v19 = vpack.c.bf16 %v293_v10, %v293_v10  ;;  %v761_v20 = vpack.c.bf16 %v294_v11, %v294_v11  ;;  %v299_v21 = vmax.f32 %v235_v12, 0.0  ;;  %v958_v11 = vld [vmem:[%s1335_s0 + $0x78] sm:$0xff]  }
  0x15   :  { %v300_v22 = vmax.f32 %v236_v13, 0.0  ;;  %v762_v25 = vpack.c.bf16 %v295_v14, %v295_v14  ;;  %v763_v26 = vpack.c.bf16 %v296_v15, %v296_v15  ;;  %v764_v27 = vpack.c.bf16 %v297_v16, %v297_v16 }
  0x16   :  { %v765_v28 = vpack.c.bf16 %v298_v17, %v298_v17  ;;  %614 = vst.msk [vmem:[#allocation2 + $0x20] sm:$0xf] %vm605_vm0, %v760_v19  ;;  %615 = vst.msk [vmem:[#allocation2 + $0x24] sm:$0xf] %vm605_vm0, %v761_v20  ;;  %v766_v30 = vpack.c.bf16 %v299_v21, %v299_v21  ;;  %v851_v33 = vunpack.c.h.bf16 %v951_v18  ;;  %v854_v34 = vunpack.c.l.bf16 %v952_v23 }
  0x17   :  { %v767_v31 = vpack.c.bf16 %v300_v22, %v300_v22  ;;  %616 = vst.msk [vmem:[#allocation2 + $0x28] sm:$0xf] %vm605_vm0, %v762_v25  ;;  %617 = vst.msk [vmem:[#allocation2 + $0x2c] sm:$0xf] %vm605_vm0, %v763_v26  ;;  %v855_v35 = vunpack.c.h.bf16 %v952_v23  ;;  %v858_v36 = vunpack.c.l.bf16 %v953_v24  ;;  %v859_v37 = vunpack.c.h.bf16 %v953_v24 }
  0x18   :  { %618 = vst.msk [vmem:[#allocation2 + $0x30] sm:$0xf] %vm605_vm0, %v764_v27  ;;  %619 = vst.msk [vmem:[#allocation2 + $0x34] sm:$0xf] %vm605_vm0, %v765_v28  ;;  %v166_v38 = vmul.f32 %v850_v32, %v1031_v1  ;;  %v167_v39 = vmul.f32 %v851_v33, %v1031_v1  ;;  %v862_v40 = vunpack.c.l.bf16 %v954_v29  ;;  %v863_v41 = vunpack.c.h.bf16 %v954_v29 }
  0x19   :  { %620 = vst.msk [vmem:[#allocation2 + $0x38] sm:$0xf] %vm605_vm0, %v766_v30  ;;  %621 = vst.msk [vmem:[#allocation2 + $0x3c] sm:$0xf] %vm605_vm0, %v767_v31  ;;  %v168_v42 = vmul.f32 %v854_v34, %v1031_v1  ;;  %v169_v43 = vmul.f32 %v855_v35, %v1031_v1  ;;  %v170_v44 = vmul.f32 %v858_v36, %v1031_v1  ;;  %v866_v14 = vunpack.c.l.bf16 %v955_v62 }
  0x1a   :  { %v171_v45 = vmul.f32 %v859_v37, %v1031_v1  ;;  %v237_v46 = vadd.f32 %v1045_v7, %v166_v38  ;;  %v238_v47 = vadd.f32 %v1045_v7, %v167_v39  ;;  %v172_v48 = vmul.f32 %v862_v40, %v1031_v1 }
  0x1b   :  { %v173_v49 = vmul.f32 %v863_v41, %v1031_v1  ;;  %v239_v50 = vadd.f32 %v1045_v7, %v168_v42  ;;  %v240_v51 = vadd.f32 %v1045_v7, %v169_v43  ;;  %v241_v52 = vadd.f32 %v1045_v7, %v170_v44  ;;  %v959_v44 = vld [vmem:[%s1335_s0 + $0x80] sm:$0xff]  }
  0x1c   :  { %v242_v53 = vadd.f32 %v1045_v7, %v171_v45  ;;  %v301_v54 = vmax.f32 %v237_v46, 0.0  ;;  %v302_v55 = vmax.f32 %v238_v47, 0.0  ;;  %v243_v56 = vadd.f32 %v1045_v7, %v172_v48 }
  0x1d   :  { %v244_v57 = vadd.f32 %v1045_v7, %v173_v49  ;;  %v303_v58 = vmax.f32 %v239_v50, 0.0  ;;  %v304_v59 = vmax.f32 %v240_v51, 0.0  ;;  %v305_v60 = vmax.f32 %v241_v52, 0.0  ;;  %v960_v49 = vld [vmem:[%s1335_s0 + $0x88] sm:$0xff]   ;;  %v961_v50 = vld [vmem:[%s1335_s0 + $0x90] sm:$0xff]  }
  0x1e   :  { %v306_v61 = vmax.f32 %v242_v53, 0.0  ;;  %v768_v63 = vpack.c.bf16 %v301_v54, %v301_v54  ;;  %v769_v0 = vpack.c.bf16 %v302_v55, %v302_v55  ;;  %v307_v2 = vmax.f32 %v243_v56, 0.0  ;;  %v962_v55 = vld [vmem:[%s1335_s0 + $0x98] sm:$0xff]  }
  0x1f   :  { %v308_v3 = vmax.f32 %v244_v57, 0.0  ;;  %v770_v6 = vpack.c.bf16 %v303_v58, %v303_v58  ;;  %v771_v8 = vpack.c.bf16 %v304_v59, %v304_v59  ;;  %v772_v9 = vpack.c.bf16 %v305_v60, %v305_v60 }
  0x20   :  { %v773_v10 = vpack.c.bf16 %v306_v61, %v306_v61  ;;  %622 = vst.msk [vmem:[#allocation2 + $0x40] sm:$0xf] %vm605_vm0, %v768_v63  ;;  %623 = vst.msk [vmem:[#allocation2 + $0x44] sm:$0xf] %vm605_vm0, %v769_v0  ;;  %v774_v12 = vpack.c.bf16 %v307_v2, %v307_v2  ;;  %v867_v15 = vunpack.c.h.bf16 %v955_v62  ;;  %v870_v16 = vunpack.c.l.bf16 %v956_v4 }
  0x21   :  { %v775_v13 = vpack.c.bf16 %v308_v3, %v308_v3  ;;  %624 = vst.msk [vmem:[#allocation2 + $0x48] sm:$0xf] %vm605_vm0, %v770_v6  ;;  %625 = vst.msk [vmem:[#allocation2 + $0x4c] sm:$0xf] %vm605_vm0, %v771_v8  ;;  %v871_v17 = vunpack.c.h.bf16 %v956_v4  ;;  %v874_v18 = vunpack.c.l.bf16 %v957_v5  ;;  %v875_v19 = vunpack.c.h.bf16 %v957_v5 }
  0x22   :  { %626 = vst.msk [vmem:[#allocation2 + $0x50] sm:$0xf] %vm605_vm0, %v772_v9  ;;  %627 = vst.msk [vmem:[#allocation2 + $0x54] sm:$0xf] %vm605_vm0, %v773_v10  ;;  %v174_v20 = vmul.f32 %v866_v14, %v1031_v1  ;;  %v175_v21 = vmul.f32 %v867_v15, %v1031_v1  ;;  %v878_v22 = vunpack.c.l.bf16 %v958_v11  ;;  %v879_v23 = vunpack.c.h.bf16 %v958_v11 }
  0x23   :  { %628 = vst.msk [vmem:[#allocation2 + $0x58] sm:$0xf] %vm605_vm0, %v774_v12  ;;  %629 = vst.msk [vmem:[#allocation2 + $0x5c] sm:$0xf] %vm605_vm0, %v775_v13  ;;  %v176_v24 = vmul.f32 %v870_v16, %v1031_v1  ;;  %v177_v25 = vmul.f32 %v871_v17, %v1031_v1  ;;  %v178_v26 = vmul.f32 %v874_v18, %v1031_v1  ;;  %v882_v58 = vunpack.c.l.bf16 %v959_v44 }
  0x24   :  { %v179_v27 = vmul.f32 %v875_v19, %v1031_v1  ;;  %v245_v28 = vadd.f32 %v1045_v7, %v174_v20  ;;  %v246_v29 = vadd.f32 %v1045_v7, %v175_v21  ;;  %v180_v30 = vmul.f32 %v878_v22, %v1031_v1 }
  0x25   :  { %v181_v31 = vmul.f32 %v879_v23, %v1031_v1  ;;  %v247_v32 = vadd.f32 %v1045_v7, %v176_v24  ;;  %v248_v33 = vadd.f32 %v1045_v7, %v177_v25  ;;  %v249_v34 = vadd.f32 %v1045_v7, %v178_v26  ;;  %v963_v26 = vld [vmem:[%s1335_s0 + $0xa0] sm:$0xff]  }
  0x26   :  { %v250_v35 = vadd.f32 %v1045_v7, %v179_v27  ;;  %v309_v36 = vmax.f32 %v245_v28, 0.0  ;;  %v310_v37 = vmax.f32 %v246_v29, 0.0  ;;  %v251_v38 = vadd.f32 %v1045_v7, %v180_v30 }
  0x27   :  { %v252_v39 = vadd.f32 %v1045_v7, %v181_v31  ;;  %v311_v40 = vmax.f32 %v247_v32, 0.0  ;;  %v312_v41 = vmax.f32 %v248_v33, 0.0  ;;  %v313_v42 = vmax.f32 %v249_v34, 0.0  ;;  %v964_v31 = vld [vmem:[%s1335_s0 + $0xa8] sm:$0xff]   ;;  %v965_v32 = vld [vmem:[%s1335_s0 + $0xb0] sm:$0xff]  }
  0x28   :  { %v314_v43 = vmax.f32 %v250_v35, 0.0  ;;  %v776_v45 = vpack.c.bf16 %v309_v36, %v309_v36  ;;  %v777_v46 = vpack.c.bf16 %v310_v37, %v310_v37  ;;  %v315_v47 = vmax.f32 %v251_v38, 0.0  ;;  %v966_v37 = vld [vmem:[%s1335_s0 + $0xb8] sm:$0xff]  }
  0x29   :  { %v316_v48 = vmax.f32 %v252_v39, 0.0  ;;  %v778_v51 = vpack.c.bf16 %v311_v40, %v311_v40  ;;  %v779_v52 = vpack.c.bf16 %v312_v41, %v312_v41  ;;  %v780_v53 = vpack.c.bf16 %v313_v42, %v313_v42 }
  0x2a   :  { %v781_v54 = vpack.c.bf16 %v314_v43, %v314_v43  ;;  %630 = vst.msk [vmem:[#allocation2 + $0x60] sm:$0xf] %vm605_vm0, %v776_v45  ;;  %631 = vst.msk [vmem:[#allocation2 + $0x64] sm:$0xf] %vm605_vm0, %v777_v46  ;;  %v782_v56 = vpack.c.bf16 %v315_v47, %v315_v47  ;;  %v883_v59 = vunpack.c.h.bf16 %v959_v44  ;;  %v886_v60 = vunpack.c.l.bf16 %v960_v49 }
  0x2b   :  { %v783_v57 = vpack.c.bf16 %v316_v48, %v316_v48  ;;  %632 = vst.msk [vmem:[#allocation2 + $0x68] sm:$0xf] %vm605_vm0, %v778_v51  ;;  %633 = vst.msk [vmem:[#allocation2 + $0x6c] sm:$0xf] %vm605_vm0, %v779_v52  ;;  %v887_v61 = vunpack.c.h.bf16 %v960_v49  ;;  %v890_v62 = vunpack.c.l.bf16 %v961_v50  ;;  %v891_v63 = vunpack.c.h.bf16 %v961_v50 }
  0x2c   :  { %634 = vst.msk [vmem:[#allocation2 + $0x70] sm:$0xf] %vm605_vm0, %v780_v53  ;;  %635 = vst.msk [vmem:[#allocation2 + $0x74] sm:$0xf] %vm605_vm0, %v781_v54  ;;  %v182_v0 = vmul.f32 %v882_v58, %v1031_v1  ;;  %v183_v2 = vmul.f32 %v883_v59, %v1031_v1  ;;  %v894_v3 = vunpack.c.l.bf16 %v962_v55  ;;  %v895_v4 = vunpack.c.h.bf16 %v962_v55 }
  0x2d   :  { %636 = vst.msk [vmem:[#allocation2 + $0x78] sm:$0xf] %vm605_vm0, %v782_v56  ;;  %637 = vst.msk [vmem:[#allocation2 + $0x7c] sm:$0xf] %vm605_vm0, %v783_v57  ;;  %v184_v5 = vmul.f32 %v886_v60, %v1031_v1  ;;  %v185_v6 = vmul.f32 %v887_v61, %v1031_v1  ;;  %v186_v8 = vmul.f32 %v890_v62, %v1031_v1  ;;  %v898_v40 = vunpack.c.l.bf16 %v963_v26 }
  0x2e   :  { %v187_v9 = vmul.f32 %v891_v63, %v1031_v1  ;;  %v253_v10 = vadd.f32 %v1045_v7, %v182_v0  ;;  %v254_v11 = vadd.f32 %v1045_v7, %v183_v2  ;;  %v188_v12 = vmul.f32 %v894_v3, %v1031_v1 }
  0x2f   :  { %v189_v13 = vmul.f32 %v895_v4, %v1031_v1  ;;  %v255_v14 = vadd.f32 %v1045_v7, %v184_v5  ;;  %v256_v15 = vadd.f32 %v1045_v7, %v185_v6  ;;  %v257_v16 = vadd.f32 %v1045_v7, %v186_v8  ;;  %v967_v8 = vld [vmem:[%s1335_s0 + $0xc0] sm:$0xff]  }
  0x30   :  { %v258_v17 = vadd.f32 %v1045_v7, %v187_v9  ;;  %v317_v18 = vmax.f32 %v253_v10, 0.0  ;;  %v318_v19 = vmax.f32 %v254_v11, 0.0  ;;  %v259_v20 = vadd.f32 %v1045_v7, %v188_v12 }
  0x31   :  { %v260_v21 = vadd.f32 %v1045_v7, %v189_v13  ;;  %v319_v22 = vmax.f32 %v255_v14, 0.0  ;;  %v320_v23 = vmax.f32 %v256_v15, 0.0  ;;  %v321_v24 = vmax.f32 %v257_v16, 0.0  ;;  %v968_v13 = vld [vmem:[%s1335_s0 + $0xc8] sm:$0xff]   ;;  %v969_v14 = vld [vmem:[%s1335_s0 + $0xd0] sm:$0xff]  }
  0x32   :  { %v322_v25 = vmax.f32 %v258_v17, 0.0  ;;  %v784_v27 = vpack.c.bf16 %v317_v18, %v317_v18  ;;  %v785_v28 = vpack.c.bf16 %v318_v19, %v318_v19  ;;  %v323_v29 = vmax.f32 %v259_v20, 0.0  ;;  %v970_v19 = vld [vmem:[%s1335_s0 + $0xd8] sm:$0xff]  }
  0x33   :  { %v324_v30 = vmax.f32 %v260_v21, 0.0  ;;  %v786_v33 = vpack.c.bf16 %v319_v22, %v319_v22  ;;  %v787_v34 = vpack.c.bf16 %v320_v23, %v320_v23  ;;  %v788_v35 = vpack.c.bf16 %v321_v24, %v321_v24 }
  0x34   :  { %v789_v36 = vpack.c.bf16 %v322_v25, %v322_v25  ;;  %638 = vst.msk [vmem:[#allocation2 + $0x80] sm:$0xf] %vm605_vm0, %v784_v27  ;;  %639 = vst.msk [vmem:[#allocation2 + $0x84] sm:$0xf] %vm605_vm0, %v785_v28  ;;  %v790_v38 = vpack.c.bf16 %v323_v29, %v323_v29  ;;  %v899_v41 = vunpack.c.h.bf16 %v963_v26  ;;  %v902_v42 = vunpack.c.l.bf16 %v964_v31 }
  0x35   :  { %v791_v39 = vpack.c.bf16 %v324_v30, %v324_v30  ;;  %640 = vst.msk [vmem:[#allocation2 + $0x88] sm:$0xf] %vm605_vm0, %v786_v33  ;;  %641 = vst.msk [vmem:[#allocation2 + $0x8c] sm:$0xf] %vm605_vm0, %v787_v34  ;;  %v903_v43 = vunpack.c.h.bf16 %v964_v31  ;;  %v906_v44 = vunpack.c.l.bf16 %v965_v32  ;;  %v907_v45 = vunpack.c.h.bf16 %v965_v32 }
  0x36   :  { %642 = vst.msk [vmem:[#allocation2 + $0x90] sm:$0xf] %vm605_vm0, %v788_v35  ;;  %643 = vst.msk [vmem:[#allocation2 + $0x94] sm:$0xf] %vm605_vm0, %v789_v36  ;;  %v190_v46 = vmul.f32 %v898_v40, %v1031_v1  ;;  %v191_v47 = vmul.f32 %v899_v41, %v1031_v1  ;;  %v910_v48 = vunpack.c.l.bf16 %v966_v37  ;;  %v911_v49 = vunpack.c.h.bf16 %v966_v37 }
  0x37   :  { %644 = vst.msk [vmem:[#allocation2 + $0x98] sm:$0xf] %vm605_vm0, %v790_v38  ;;  %645 = vst.msk [vmem:[#allocation2 + $0x9c] sm:$0xf] %vm605_vm0, %v791_v39  ;;  %v192_v50 = vmul.f32 %v902_v42, %v1031_v1  ;;  %v193_v51 = vmul.f32 %v903_v43, %v1031_v1  ;;  %v194_v52 = vmul.f32 %v906_v44, %v1031_v1  ;;  %v914_v22 = vunpack.c.l.bf16 %v967_v8 }
  0x38   :  { %v195_v53 = vmul.f32 %v907_v45, %v1031_v1  ;;  %v261_v54 = vadd.f32 %v1045_v7, %v190_v46  ;;  %v262_v55 = vadd.f32 %v1045_v7, %v191_v47  ;;  %v196_v56 = vmul.f32 %v910_v48, %v1031_v1 }
  0x39   :  { %v197_v57 = vmul.f32 %v911_v49, %v1031_v1  ;;  %v263_v58 = vadd.f32 %v1045_v7, %v192_v50  ;;  %v264_v59 = vadd.f32 %v1045_v7, %v193_v51  ;;  %v265_v60 = vadd.f32 %v1045_v7, %v194_v52  ;;  %v971_v52 = vld [vmem:[%s1335_s0 + $0xe0] sm:$0xff]  }
  0x3a   :  { %v266_v61 = vadd.f32 %v1045_v7, %v195_v53  ;;  %v325_v62 = vmax.f32 %v261_v54, 0.0  ;;  %v326_v63 = vmax.f32 %v262_v55, 0.0  ;;  %v267_v0 = vadd.f32 %v1045_v7, %v196_v56 }
  0x3b   :  { %v268_v2 = vadd.f32 %v1045_v7, %v197_v57  ;;  %v327_v3 = vmax.f32 %v263_v58, 0.0  ;;  %v328_v4 = vmax.f32 %v264_v59, 0.0  ;;  %v329_v5 = vmax.f32 %v265_v60, 0.0  ;;  %v972_v57 = vld [vmem:[%s1335_s0 + $0xe8] sm:$0xff]   ;;  %v973_v58 = vld [vmem:[%s1335_s0 + $0xf0] sm:$0xff]  }
  0x3c   :  { %v330_v6 = vmax.f32 %v266_v61, 0.0  ;;  %v792_v9 = vpack.c.bf16 %v325_v62, %v325_v62  ;;  %v793_v10 = vpack.c.bf16 %v326_v63, %v326_v63  ;;  %v331_v11 = vmax.f32 %v267_v0, 0.0  ;;  %v974_v63 = vld [vmem:[%s1335_s0 + $0xf8] sm:$0xff]   ;;  %s1002_s0 = smov [#allocation2]  }
  0x3d   :  { %v332_v12 = vmax.f32 %v268_v2, 0.0  ;;  %v794_v15 = vpack.c.bf16 %v327_v3, %v327_v3  ;;  %v795_v16 = vpack.c.bf16 %v328_v4, %v328_v4  ;;  %v796_v17 = vpack.c.bf16 %v329_v5, %v329_v5  ;;  %s675_s22 = sshll.u32 %s1002_s0, 4  ;;  %s676_s22 = int_to_ptr.vmem [resolvable:$true] %s675_s22 }
  0x3e   :  { %v797_v18 = vpack.c.bf16 %v330_v6, %v330_v6  ;;  %646 = vst.msk [vmem:[#allocation2 + $0xa0] sm:$0xf] %vm605_vm0, %v792_v9  ;;  %647 = vst.msk [vmem:[#allocation2 + $0xa4] sm:$0xf] %vm605_vm0, %v793_v10  ;;  %v798_v20 = vpack.c.bf16 %v331_v11, %v331_v11  ;;  %v915_v23 = vunpack.c.h.bf16 %v967_v8  ;;  %v918_v24 = vunpack.c.l.bf16 %v968_v13  ;;  %s978_s23 = scalar_lea.vmem %s676_s22, 4096  ;;  %p983_p1 = scmp.lt.s32.totalorder %s676_s22, %s676_s22 }
  0x3f   :  { %v799_v21 = vpack.c.bf16 %v332_v12, %v332_v12  ;;  %648 = vst.msk [vmem:[#allocation2 + $0xa8] sm:$0xf] %vm605_vm0, %v794_v15  ;;  %649 = vst.msk [vmem:[#allocation2 + $0xac] sm:$0xf] %vm605_vm0, %v795_v16  ;;  %v919_v25 = vunpack.c.h.bf16 %v968_v13  ;;  %v922_v26 = vunpack.c.l.bf16 %v969_v14  ;;  %v923_v27 = vunpack.c.h.bf16 %v969_v14  ;;  %p979_p0 = scmp.ne.s32.totalorder %s676_s22, %s978_s23  ;;  %p984_p2 = scmp.lt.s32.totalorder %s978_s23, %s978_s23 }
  0x40   :  { %650 = vst.msk [vmem:[#allocation2 + $0xb0] sm:$0xf] %vm605_vm0, %v796_v17  ;;  %651 = vst.msk [vmem:[#allocation2 + $0xb4] sm:$0xf] %vm605_vm0, %v797_v18  ;;  %v198_v28 = vmul.f32 %v914_v22, %v1031_v1  ;;  %v199_v29 = vmul.f32 %v915_v23, %v1031_v1  ;;  %v926_v30 = vunpack.c.l.bf16 %v970_v19  ;;  %v927_v31 = vunpack.c.h.bf16 %v970_v19 }
  0x41   :  { %652 = vst.msk [vmem:[#allocation2 + $0xb8] sm:$0xf] %vm605_vm0, %v798_v20  ;;  %653 = vst.msk [vmem:[#allocation2 + $0xbc] sm:$0xf] %vm605_vm0, %v799_v21  ;;  %v200_v32 = vmul.f32 %v918_v24, %v1031_v1  ;;  %v201_v33 = vmul.f32 %v919_v25, %v1031_v1  ;;  %v202_v34 = vmul.f32 %v922_v26, %v1031_v1  ;;  %v930_v3 = vunpack.c.l.bf16 %v971_v52  ;;  %p985_p3 = por %p984_p2, %p983_p1 }
  0x42   :  { %v203_v35 = vmul.f32 %v923_v27, %v1031_v1  ;;  %v269_v36 = vadd.f32 %v1045_v7, %v198_v28  ;;  %v270_v37 = vadd.f32 %v1045_v7, %v199_v29  ;;  %v204_v38 = vmul.f32 %v926_v30, %v1031_v1 }
  0x43   :  { %v205_v39 = vmul.f32 %v927_v31, %v1031_v1  ;;  %v271_v40 = vadd.f32 %v1045_v7, %v200_v32  ;;  %v272_v41 = vadd.f32 %v1045_v7, %v201_v33  ;;  %v273_v42 = vadd.f32 %v1045_v7, %v202_v34  ;;  %p986_p4 = pnand %p985_p3, %p979_p0 }
  0x44   :  { %v274_v43 = vadd.f32 %v1045_v7, %v203_v35  ;;  %v333_v44 = vmax.f32 %v269_v36, 0.0  ;;  %v334_v45 = vmax.f32 %v270_v37, 0.0  ;;  %v275_v46 = vadd.f32 %v1045_v7, %v204_v38 }
  0x45   :  { %v276_v47 = vadd.f32 %v1045_v7, %v205_v39  ;;  %v335_v48 = vmax.f32 %v271_v40, 0.0  ;;  %v336_v49 = vmax.f32 %v272_v41, 0.0  ;;  %v337_v50 = vmax.f32 %v273_v42, 0.0 }
  0x46   :  { %v338_v51 = vmax.f32 %v274_v43, 0.0  ;;  %v800_v53 = vpack.c.bf16 %v333_v44, %v333_v44  ;;  %v801_v54 = vpack.c.bf16 %v334_v45, %v334_v45  ;;  %v339_v55 = vmax.f32 %v275_v46, 0.0 }
  0x47   :  { %v340_v56 = vmax.f32 %v276_v47, 0.0  ;;  %v802_v59 = vpack.c.bf16 %v335_v48, %v335_v48  ;;  %v803_v60 = vpack.c.bf16 %v336_v49, %v336_v49  ;;  %v804_v61 = vpack.c.bf16 %v337_v50, %v337_v50 }
  0x48   :  { %v805_v62 = vpack.c.bf16 %v338_v51, %v338_v51  ;;  %654 = vst.msk [vmem:[#allocation2 + $0xc0] sm:$0xf] %vm605_vm0, %v800_v53  ;;  %655 = vst.msk [vmem:[#allocation2 + $0xc4] sm:$0xf] %vm605_vm0, %v801_v54  ;;  %v806_v0 = vpack.c.bf16 %v339_v55, %v339_v55  ;;  %v931_v4 = vunpack.c.h.bf16 %v971_v52  ;;  %v934_v5 = vunpack.c.l.bf16 %v972_v57 }
  0x49   :  { %v807_v2 = vpack.c.bf16 %v340_v56, %v340_v56  ;;  %656 = vst.msk [vmem:[#allocation2 + $0xc8] sm:$0xf] %vm605_vm0, %v802_v59  ;;  %657 = vst.msk [vmem:[#allocation2 + $0xcc] sm:$0xf] %vm605_vm0, %v803_v60  ;;  %v935_v6 = vunpack.c.h.bf16 %v972_v57  ;;  %v938_v8 = vunpack.c.l.bf16 %v973_v58  ;;  %v939_v9 = vunpack.c.h.bf16 %v973_v58 }
  0x4a   :  { %658 = vst.msk [vmem:[#allocation2 + $0xd0] sm:$0xf] %vm605_vm0, %v804_v61  ;;  %659 = vst.msk [vmem:[#allocation2 + $0xd4] sm:$0xf] %vm605_vm0, %v805_v62  ;;  %v206_v10 = vmul.f32 %v930_v3, %v1031_v1  ;;  %v207_v11 = vmul.f32 %v931_v4, %v1031_v1  ;;  %v942_v12 = vunpack.c.l.bf16 %v974_v63  ;;  %v943_v13 = vunpack.c.h.bf16 %v974_v63 }
  0x4b   :  { %660 = vst.msk [vmem:[#allocation2 + $0xd8] sm:$0xf] %vm605_vm0, %v806_v0  ;;  %661 = vst.msk [vmem:[#allocation2 + $0xdc] sm:$0xf] %vm605_vm0, %v807_v2  ;;  %v208_v14 = vmul.f32 %v934_v5, %v1031_v1  ;;  %v209_v15 = vmul.f32 %v935_v6, %v1031_v1  ;;  %v210_v16 = vmul.f32 %v938_v8, %v1031_v1 }
  0x4c   :  { %v211_v17 = vmul.f32 %v939_v9, %v1031_v1  ;;  %v277_v18 = vadd.f32 %v1045_v7, %v206_v10  ;;  %v278_v19 = vadd.f32 %v1045_v7, %v207_v11  ;;  %v212_v20 = vmul.f32 %v942_v12, %v1031_v1 }
  0x4d   :  { %v213_v21 = vmul.f32 %v943_v13, %v1031_v1  ;;  %v279_v22 = vadd.f32 %v1045_v7, %v208_v14  ;;  %v280_v23 = vadd.f32 %v1045_v7, %v209_v15  ;;  %v281_v24 = vadd.f32 %v1045_v7, %v210_v16 }
  0x4e   :  { %v282_v25 = vadd.f32 %v1045_v7, %v211_v17  ;;  %v341_v26 = vmax.f32 %v277_v18, 0.0  ;;  %v342_v27 = vmax.f32 %v278_v19, 0.0  ;;  %v283_v28 = vadd.f32 %v1045_v7, %v212_v20 }
  0x4f   :  { %v284_v29 = vadd.f32 %v1045_v7, %v213_v21  ;;  %v343_v30 = vmax.f32 %v279_v22, 0.0  ;;  %v344_v31 = vmax.f32 %v280_v23, 0.0  ;;  %v345_v32 = vmax.f32 %v281_v24, 0.0 }
  0x50   :  { %v346_v33 = vmax.f32 %v282_v25, 0.0  ;;  %v808_v1 = vpack.c.bf16 %v341_v26, %v341_v26  ;;  %v809_v34 = vpack.c.bf16 %v342_v27, %v342_v27  ;;  %v347_v35 = vmax.f32 %v283_v28, 0.0 }
  0x51   :  { %v348_v36 = vmax.f32 %v284_v29, 0.0  ;;  %v810_v37 = vpack.c.bf16 %v343_v30, %v343_v30  ;;  %v811_v38 = vpack.c.bf16 %v344_v31, %v344_v31  ;;  %v812_v39 = vpack.c.bf16 %v345_v32, %v345_v32 }
  0x52   :  { %v813_v40 = vpack.c.bf16 %v346_v33, %v346_v33  ;;  %662 = vst.msk [vmem:[#allocation2 + $0xe0] sm:$0xf] %vm605_vm0, %v808_v1  ;;  %663 = vst.msk [vmem:[#allocation2 + $0xe4] sm:$0xf] %vm605_vm0, %v809_v34  ;;  %v814_v41 = vpack.c.bf16 %v347_v35, %v347_v35 }
  0x53   :  { %v815_v7 = vpack.c.bf16 %v348_v36, %v348_v36  ;;  %664 = vst.msk [vmem:[#allocation2 + $0xe8] sm:$0xf] %vm605_vm0, %v810_v37  ;;  %665 = vst.msk [vmem:[#allocation2 + $0xec] sm:$0xf] %vm605_vm0, %v811_v38 }
  0x54   :  { %666 = vst.msk [vmem:[#allocation2 + $0xf0] sm:$0xf] %vm605_vm0, %v812_v39  ;;  %667 = vst.msk [vmem:[#allocation2 + $0xf4] sm:$0xf] %vm605_vm0, %v813_v40 }
  0x55   :  { %668 = vst.msk [vmem:[#allocation2 + $0xf8] sm:$0xf] %vm605_vm0, %v814_v41  ;;  %669 = vst.msk [vmem:[#allocation2 + $0xfc] sm:$0xf] %vm605_vm0, %v815_v7 }
  0x56   :  { %989 = shalt.err (!%p986_p4)
}
  0x57   :  { %s990_s24 = scalar_lea.hbm %s1338_s3, 4096 }
  0x58   :  { %p991_p5 = scmp.ne.s32.totalorder %s1338_s3, %s990_s24  ;;  %p994_p6 = scmp.lt.u32.totalorder %s990_s24, %s1338_s3 }
  0x5a   :  { %p996_p7 = pnand %p994_p6, %p991_p5 }
  0x5c   :  { %999 = shalt.err (!%p996_p7)
}
  0x5d   :  { %s1003_s29 = smov 64   ;;  %s1004_s30 = smov 4  }
  0x5e   :  { %681 = dma.vmem_to_hbm [thread:$0]  %s676_s22, 4096, %s1338_s3, [#allocation3], %s1003_s29, %s1003_s29, %s1004_s30  }
  0x5f   :  { %1000 = dma.done.wait [#allocation3], 4096  }
  0x60   :  { %1001 = vsyncadd [#allocation3], 4294963200 }
  0x61   :  { %685 = vsyncpa [#allocation3], 1 }

// kernel: conv_bn.2
= control target key start
LH: loop header
LB: loop body
LE: loop exit
PB: predicated region body
PF: predicated region fallthrough
CT: control target
= control target key end

     0   :  { %s2348_s12 = smov 0   ;;  %s2350_s13 = smov 0   ;;  %s2918_s0 = inlined_call_operand.vmem [shape: bf16[512,392], index: 0, kind: input, shape index: {}]   ;;  %s2919_s1 = inlined_call_operand.vmem [shape: bf16[392,64], index: 1, kind: input, shape index: {}]   ;;  %s2920_s2 = inlined_call_operand.vmem [shape: bf16[512,64], index: 2, kind: output, shape index: {0}]   ;;  %s2921_s3 = inlined_call_operand.vmem [shape: f32[16,64], index: 3, kind: output, shape index: {1}]  }
   0x1   :  { %s2352_s14 = smov 0  }
   0x2 LB: > { %s33_s15 = sadd.s32 1, %s2320_s13  ;;  %p1864_p0 = scmp.ge.s32.totalorder %s2324_s14, 1  ;;  %s2324_s14 = sphi %s2352_s14, %s14_s14   ;;  %s2320_s13 = sphi %s2350_s13, %s2923_s13   ;;  %s2316_s12 = sphi %s2348_s12, %s2922_s12  }
   0x3   : > { %p35_p1 = scmp.ge.s32.totalorder %s33_s15, 2  ;;  %p188_p2 = scmp.lt.s32.totalorder %s2324_s14, 3 }
   0x5   : > { %s2925_s15 = smov (%p35_p1, %s33_s15), 0  ;;  %p189_p3 = pnand %p1864_p0, %p188_p2 }
   0x6   : > { %v2181_v0 = vld [vmem:[%s2919_s1 + $0x40] sm:$0xff] (!%p189_p3)   ;;  %v2326_v1 = vmov (!%p189_p3), 0   ;;  %v2184_v4 = vld [vmem:[%s2919_s1 + $0x48] sm:$0xff] (!%p189_p3)   ;;  %v2187_v7 = vld [vmem:[%s2919_s1 + $0x50] sm:$0xff] (!%p189_p3)   ;;  %s1865_s7 = sshll.u32 (!%p189_p3), %s2316_s12, 5  ;;  %vm906_vm0 = vcmask (!%p189_p3), 64512  }
   0x7   : > { %192 = sbr.rel (%p189_p3) target bundleno = 407 (0x197), region = 28  ;;  %1120 = vmatprep.subr.bf16.mxu1 (!%p189_p3), %v2326_v1  ;;  %v2182_v2 = vld [vmem:[%s2919_s1 + $0x80] sm:$0xff] (!%p189_p3)   ;;  %2043 = vmatprep.subr.bf16.mxu0 (!%p189_p3), %v2181_v0  ;;  %v2185_v5 = vld [vmem:[%s2919_s1 + $0x88] sm:$0xff] (!%p189_p3)   ;;  %v2188_v8 = vld [vmem:[%s2919_s1 + $0x90] sm:$0xff] (!%p189_p3)   ;;  %p237_p4 = scmp.lt.s32.totalorder (!%p189_p3), %s1865_s7, 63  ;;  %vm955_vm1 = vcmask (!%p189_p3), 1043456  }
   0x8   : > { %v2183_v3 = vld [vmem:[%s2919_s1] sm:$0xff] (!%p189_p3)   ;;  %1121 = vmatpush1.bf16.msra.mxu1 (!%p189_p3), %v2182_v2  ;;  %v2186_v6 = vld [vmem:[%s2919_s1 + $0x8] sm:$0xff] (!%p189_p3)   ;;  %v2189_v9 = vld [vmem:[%s2919_s1 + $0x10] sm:$0xff] (!%p189_p3)   ;;  %vm277_vm2 = vcmask (!%p189_p3), 523264   ;;  %p265_p5 = scmp.lt.s32.totalorder (!%p189_p3), %s2316_s12, 1  ;;  %vm1509_vm3 = vcmask (!%p189_p3), 519168  }
   0x9   : > { %2044 = vmatpush3.bf16.msra.mxu0 (!%p189_p3), %v2183_v3  ;;  %1122 = vmatprep.subr.bf16.mxu1 (!%p189_p3), %v2326_v1  ;;  %v2190_v10 = vld [vmem:[%s2919_s1 + $0x58] sm:$0xff] (!%p189_p3)   ;;  %v2193_v13 = vld [vmem:[%s2919_s1 + $0x60] sm:$0xff] (!%p189_p3)   ;;  %v2196_v16 = vld [vmem:[%s2919_s1 + $0x68] sm:$0xff] (!%p189_p3)   ;;  %vm1612_vm4 = vcmask (!%p189_p3), 516096  }
   0xa   : > { %2045 = vmatprep.subr.bf16.mxu0 (!%p189_p3), %v2184_v4  ;;  %v2191_v11 = vld [vmem:[%s2919_s1 + $0x98] sm:$0xff] (!%p189_p3)   ;;  %v2194_v14 = vld [vmem:[%s2919_s1 + $0xa0] sm:$0xff] (!%p189_p3)   ;;  %v2197_v17 = vld [vmem:[%s2919_s1 + $0xa8] sm:$0xff] (!%p189_p3)  }
   0xb   : > { %v2192_v12 = vld [vmem:[%s2919_s1 + $0x18] sm:$0xff] (!%p189_p3)   ;;  %v2195_v15 = vld [vmem:[%s2919_s1 + $0x20] sm:$0xff] (!%p189_p3)   ;;  %v2198_v18 = vld [vmem:[%s2919_s1 + $0x28] sm:$0xff] (!%p189_p3)  }
   0xc   : > { %1123 = vmatpush1.bf16.msra.mxu1 (!%p189_p3), %v2185_v5  ;;  %v2199_v19 = vld [vmem:[%s2919_s1 + $0x70] sm:$0xff] (!%p189_p3)   ;;  %v2202_v22 = vld [vmem:[%s2919_s1 + $0x78] sm:$0xff] (!%p189_p3)   ;;  %v2208_v27 = vld [vmem:[%s2919_s1 + $0xc0] ss:$0 sps:$4 sm:$0xff] (!%p189_p3)  }
   0xd   : > { %2046 = vmatpush3.bf16.msra.mxu0 (!%p189_p3), %v2186_v6  ;;  %1124 = vmatprep.subr.bf16.mxu1 (!%p189_p3), %v2326_v1  ;;  %v2200_v20 = vld [vmem:[%s2919_s1 + $0xb0] sm:$0xff] (!%p189_p3)   ;;  %v2203_v24 = vld [vmem:[%s2919_s1 + $0xb8] sm:$0xff] (!%p189_p3)   ;;  %v957_v29 = vsel (!%p189_p3), %vm955_vm1, %v2208_v27, 0 }
   0xe   : > { %2047 = vmatprep.subr.bf16.mxu0 %v2187_v7  ;;  %s2927_s7 = smov (!%p237_p4, %s1865_s7), 63  ;;  %v2201_v21 = vld [vmem:[%s2919_s1 + $0x30] sm:$0xff]   ;;  %v2204_v26 = vld [vmem:[%s2919_s1 + $0x38] sm:$0xff]   ;;  %s2929_s12 = smov (!%p265_p5, %s2316_s12), 1 }
   0xf   : > { %s2010_s28 = sshll.u32 %s2927_s7, 4  ;;  %s1869_s26 = sshll.u32 %s2927_s7, 2 }
  0x10   : > { %1125 = vmatpush1.bf16.msra.mxu1 %v2188_v8  ;;  %s2438_s9 = scalar_lea.vmem %s2918_s0, %s2010_s28  ;;  %s2613_s29 = scalar_lea.vmem %s2920_s2, %s1869_s26 }
  0x11   : > { %2048 = vmatpush3.bf16.msra.mxu0 %v2189_v9  ;;  %1126 = vmatprep.subr.bf16.mxu1 %v2326_v1  ;;  %v2207_v23 = vld [vmem:[%s2438_s9 + $0x4] ss:$16 sps:$4 sm:$0xff]   ;;  %v2211_v25 = vld [vmem:[%s2438_s9 + $0xc] ss:$16 sps:$4 sm:$0xff]   ;;  %v2205_v28 = vld [vmem:[%s2438_s9] ss:$16 sps:$4 sm:$0xff]  }
  0x12   : > { %2049 = vmatprep.subr.bf16.mxu0 %v2190_v10  ;;  %991 = vmatprep.mubr.bf16.mxu0 %v2207_v23  ;;  %v2212_v30 = vld [vmem:[%s2438_s9 + $0x24] ss:$16 sps:$4 sm:$0xff]   ;;  %v2209_v31 = vld [vmem:[%s2438_s9 + $0x8] ss:$16 sps:$4 sm:$0xff]   ;;  %v2215_v32 = vld [vmem:[%s2438_s9 + $0x2c] ss:$16 sps:$4 sm:$0xff]  }
  0x13   : > { %1960 = vmatprep.mubr.msk.bf16.mxu1 %vm906_vm0, %v2211_v25  ;;  %v2214_v33 = vld [vmem:[%s2438_s9 + $0x20] ss:$16 sps:$4 sm:$0xff]   ;;  %v2218_v34 = vld [vmem:[%s2438_s9 + $0x44] ss:$16 sps:$4 sm:$0xff]   ;;  %v2217_v35 = vld [vmem:[%s2438_s9 + $0x28] ss:$16 sps:$4 sm:$0xff]  }
  0x14   : > { %1127 = vmatpush1.bf16.msra.mxu1 %v2191_v11  ;;  %v2221_v36 = vld [vmem:[%s2438_s9 + $0x4c] ss:$16 sps:$4 sm:$0xff]   ;;  %v2220_v37 = vld [vmem:[%s2438_s9 + $0x40] ss:$16 sps:$4 sm:$0xff]   ;;  %v2224_v38 = vld [vmem:[%s2438_s9 + $0x64] ss:$16 sps:$4 sm:$0xff]  }
  0x15   : > { %2050 = vmatpush3.bf16.msra.mxu0 %v2192_v12  ;;  %1128 = vmatprep.subr.bf16.mxu1 %v2326_v1  ;;  %v2223_v39 = vld [vmem:[%s2438_s9 + $0x48] ss:$16 sps:$4 sm:$0xff]   ;;  %v2227_v40 = vld [vmem:[%s2438_s9 + $0x6c] ss:$16 sps:$4 sm:$0xff]   ;;  %v2226_v41 = vld [vmem:[%s2438_s9 + $0x60] ss:$16 sps:$4 sm:$0xff]  }
  0x16   : > { %2051 = vmatprep.subr.bf16.mxu0 %v2193_v13  ;;  %v2230_v42 = vld [vmem:[%s2438_s9 + $0x84] ss:$16 sps:$4 sm:$0xff]   ;;  %v2229_v43 = vld [vmem:[%s2438_s9 + $0x68] ss:$16 sps:$4 sm:$0xff]   ;;  %v2233_v44 = vld [vmem:[%s2438_s9 + $0x8c] ss:$16 sps:$4 sm:$0xff]  }
  0x17   : > { %v2232_v45 = vld [vmem:[%s2438_s9 + $0x80] ss:$16 sps:$4 sm:$0xff]   ;;  %v2236_v46 = vld [vmem:[%s2438_s9 + $0xa4] ss:$16 sps:$4 sm:$0xff]   ;;  %v2235_v47 = vld [vmem:[%s2438_s9 + $0x88] ss:$16 sps:$4 sm:$0xff]  }
  0x18   : > { %1129 = vmatpush1.bf16.msra.mxu1 %v2194_v14  ;;  %v2239_v48 = vld [vmem:[%s2438_s9 + $0xac] ss:$16 sps:$4 sm:$0xff]   ;;  %v2238_v49 = vld [vmem:[%s2438_s9 + $0xa0] ss:$16 sps:$4 sm:$0xff]   ;;  %v2242_v50 = vld [vmem:[%s2438_s9 + $0xc4] ss:$16 sps:$4 sm:$0xff]  }
  0x19   : > { %2052 = vmatpush3.bf16.msra.mxu0 %v2195_v15  ;;  %1130 = vmatprep.subr.bf16.mxu1 %v2326_v1  ;;  %v2241_v51 = vld [vmem:[%s2438_s9 + $0xa8] ss:$16 sps:$4 sm:$0xff]   ;;  %v2245_v52 = vld [vmem:[%s2438_s9 + $0xcc] ss:$16 sps:$4 sm:$0xff]   ;;  %v2244_v53 = vld [vmem:[%s2438_s9 + $0xc0] ss:$16 sps:$4 sm:$0xff]  }
  0x1a   : > { %2053 = vmatprep.subr.bf16.mxu0 %v2196_v16  ;;  %v2248_v54 = vld [vmem:[%s2438_s9 + $0xe4] ss:$16 sps:$4 sm:$0xff]   ;;  %v2247_v55 = vld [vmem:[%s2438_s9 + $0xc8] ss:$16 sps:$4 sm:$0xff]   ;;  %v2251_v56 = vld [vmem:[%s2438_s9 + $0xec] ss:$16 sps:$4 sm:$0xff]  }
  0x1b   : > { %v2250_v57 = vld [vmem:[%s2438_s9 + $0xe0] ss:$16 sps:$4 sm:$0xff]   ;;  %v2254_v58 = vld [vmem:[%s2438_s9 + $0x104] ss:$16 sps:$4 sm:$0xff]   ;;  %v2253_v59 = vld [vmem:[%s2438_s9 + $0xe8] ss:$16 sps:$4 sm:$0xff]  }
  0x1c   : > { %1131 = vmatpush1.bf16.msra.mxu1 %v2197_v17  ;;  %v2257_v60 = vld [vmem:[%s2438_s9 + $0x10c] ss:$16 sps:$4 sm:$0xff]   ;;  %v2256_v61 = vld [vmem:[%s2438_s9 + $0x100] ss:$16 sps:$4 sm:$0xff]   ;;  %v2260_v62 = vld [vmem:[%s2438_s9 + $0x124] ss:$16 sps:$4 sm:$0xff]  }
  0x1d   : > { %2054 = vmatpush3.bf16.msra.mxu0 %v2198_v18  ;;  %1132 = vmatprep.subr.bf16.mxu1 %v2326_v1  ;;  %v2259_v63 = vld [vmem:[%s2438_s9 + $0x108] ss:$16 sps:$4 sm:$0xff]   ;;  %v2263_v0 = vld [vmem:[%s2438_s9 + $0x12c] ss:$16 sps:$4 sm:$0xff]   ;;  %v2266_v2 = vld [vmem:[%s2438_s9 + $0x144] ss:$16 sps:$4 sm:$0xff]  }
  0x1e   : > { %2055 = vmatprep.subr.bf16.mxu0 %v2199_v19  ;;  %v2265_v3 = vld [vmem:[%s2438_s9 + $0x128] ss:$16 sps:$4 sm:$0xff]   ;;  %v2269_v4 = vld [vmem:[%s2438_s9 + $0x14c] ss:$16 sps:$4 sm:$0xff]   ;;  %v2268_v5 = vld [vmem:[%s2438_s9 + $0x140] ss:$16 sps:$4 sm:$0xff]  }
  0x1f   : > { %v2272_v6 = vld [vmem:[%s2438_s9 + $0x164] ss:$16 sps:$4 sm:$0xff]   ;;  %v2271_v7 = vld [vmem:[%s2438_s9 + $0x148] ss:$16 sps:$4 sm:$0xff]   ;;  %v2275_v8 = vld [vmem:[%s2438_s9 + $0x16c] ss:$16 sps:$4 sm:$0xff]  }
  0x20   : > { %1133 = vmatpush1.bf16.msra.mxu1 %v2200_v20  ;;  %v2327_v9 = vmov 0.0   ;;  %v2274_v10 = vld [vmem:[%s2438_s9 + $0x160] ss:$16 sps:$4 sm:$0xff]   ;;  %v2278_v11 = vld [vmem:[%s2438_s9 + $0x184] ss:$16 sps:$4 sm:$0xff]   ;;  %s1870_s7 = sshll.u32 %s2929_s12, 3 }
  0x21   : > { %2056 = vmatpush3.bf16.msra.mxu0 %v2201_v21  ;;  %1134 = vmatprep.subr.bf16.mxu1 %v2326_v1  ;;  %278 = vst.msk [vmem:[#allocation2] sm:$0xff] %vm277_vm2, %v2327_v9  ;;  %279 = vst.msk [vmem:[#allocation2 + $0x8] sm:$0xff] %vm277_vm2, %v2327_v9  ;;  %v2277_v12 = vld [vmem:[%s2438_s9 + $0x168] ss:$16 sps:$4 sm:$0xff]   ;;  %v2281_v13 = vld [vmem:[%s2438_s9 + $0x18c] ss:$16 sps:$4 sm:$0xff]   ;;  %s2625_s5 = scalar_lea.vmem %s2921_s3, %s1870_s7 }
  0x22   : > { %2057 = vmatprep.subr.bf16.mxu0 %v2202_v22  ;;  %280 = vst.msk [vmem:[#allocation2 + $0x10] sm:$0xff] %vm277_vm2, %v2327_v9  ;;  %281 = vst.msk [vmem:[#allocation2 + $0x18] sm:$0xff] %vm277_vm2, %v2327_v9  ;;  %v2280_v14 = vld [vmem:[%s2438_s9 + $0x180] ss:$16 sps:$4 sm:$0xff]   ;;  %v2284_v15 = vld [vmem:[%s2438_s9 + $0x1a4] ss:$16 sps:$4 sm:$0xff]  }
  0x23   : > { %282 = vst.msk [vmem:[#allocation2 + $0x20] sm:$0xff] %vm277_vm2, %v2327_v9  ;;  %283 = vst.msk [vmem:[#allocation2 + $0x28] sm:$0xff] %vm277_vm2, %v2327_v9  ;;  %v2283_v16 = vld [vmem:[%s2438_s9 + $0x188] ss:$16 sps:$4 sm:$0xff]   ;;  %v2287_v17 = vld [vmem:[%s2438_s9 + $0x1ac] ss:$16 sps:$4 sm:$0xff]  }
  0x24   : > { %1135 = vmatpush1.bf16.msra.mxu1 %v2203_v24  ;;  %284 = vst.msk [vmem:[#allocation2 + $0x30] sm:$0xff] %vm277_vm2, %v2327_v9  ;;  %285 = vst.msk [vmem:[#allocation2 + $0x38] sm:$0xff] %vm277_vm2, %v2327_v9  ;;  %v2286_v18 = vld [vmem:[%s2438_s9 + $0x1a0] ss:$16 sps:$4 sm:$0xff]   ;;  %v2290_v19 = vld [vmem:[%s2438_s9 + $0x1c4] ss:$16 sps:$4 sm:$0xff]  }
  0x25   : > { %2058 = vmatpush3.bf16.msra.mxu0 %v2204_v26  ;;  %1136 = vmatprep.subr.bf16.mxu1 %v2326_v1  ;;  %v2262_v1 = vld [vmem:[%s2438_s9 + $0x120] ss:$16 sps:$4 sm:$0xff]   ;;  %286 = vst.msk [vmem:[#allocation2 + $0x40] sm:$0xff] %vm277_vm2, %v2327_v9  ;;  %287 = vst.msk [vmem:[#allocation2 + $0x48] sm:$0xff] %vm277_vm2, %v2327_v9  ;;  %v2289_v20 = vld [vmem:[%s2438_s9 + $0x1a8] ss:$16 sps:$4 sm:$0xff]  }
  0x26   : > { %288 = vst.msk [vmem:[#allocation2 + $0x50] sm:$0xff] %vm277_vm2, %v2327_v9  ;;  %289 = vst.msk [vmem:[#allocation2 + $0x58] sm:$0xff] %vm277_vm2, %v2327_v9  ;;  %v2293_v21 = vld [vmem:[%s2438_s9 + $0x1cc] ss:$16 sps:$4 sm:$0xff]   ;;  %v2292_v22 = vld [vmem:[%s2438_s9 + $0x1c0] ss:$16 sps:$4 sm:$0xff]  }
  0x27   : > { %290 = vst.msk [vmem:[#allocation2 + $0x60] sm:$0xff] %vm277_vm2, %v2327_v9  ;;  %291 = vst.msk [vmem:[#allocation2 + $0x68] sm:$0xff] %vm277_vm2, %v2327_v9  ;;  %v2296_v23 = vld [vmem:[%s2438_s9 + $0x1e4] ss:$16 sps:$4 sm:$0xff]   ;;  %v2295_v24 = vld [vmem:[%s2438_s9 + $0x1c8] ss:$16 sps:$4 sm:$0xff]  }
  0x28   : > { %992 = vmatmul.mubr.bf16.vlgmr.msra.gmra.mrb[0].mxu0 %v2205_v28  ;;  %1137 = vmatpush1.bf16.msra.mxu1 %v957_v29  ;;  %292 = vst.msk [vmem:[#allocation2 + $0x70] sm:$0xff] %vm277_vm2, %v2327_v9  ;;  %293 = vst.msk [vmem:[#allocation2 + $0x78] sm:$0xff] %vm277_vm2, %v2327_v9  ;;  %v2299_v25 = vld [vmem:[%s2438_s9 + $0x1ec] ss:$16 sps:$4 sm:$0xff]   ;;  %v2298_v26 = vld [vmem:[%s2438_s9 + $0x1e0] ss:$16 sps:$4 sm:$0xff]  }
  0x29   : > { %999 = vmatprep.mubr.bf16.mxu0 %v2212_v30  ;;  %294 = vst.msk [vmem:[#allocation2 + $0x80] sm:$0xff] %vm277_vm2, %v2327_v9  ;;  %295 = vst.msk [vmem:[#allocation2 + $0x88] sm:$0xff] %vm277_vm2, %v2327_v9  ;;  %v2301_v27 = vld [vmem:[%s2438_s9 + $0x1e8] ss:$16 sps:$4 sm:$0xff]  }
  0x2a   : > { %296 = vst.msk [vmem:[#allocation2 + $0x90] sm:$0xff] %vm277_vm2, %v2327_v9  ;;  %297 = vst.msk [vmem:[#allocation2 + $0x98] sm:$0xff] %vm277_vm2, %v2327_v9 }
  0x2b   : > { %1153 = vmatmul.mubr.bf16.vlgmr.msra.gmra.mrb[0].mxu1 %v2209_v31  ;;  %298 = vst.msk [vmem:[#allocation2 + $0xa0] sm:$0xff] %vm277_vm2, %v2327_v9  ;;  %299 = vst.msk [vmem:[#allocation2 + $0xa8] sm:$0xff] %vm277_vm2, %v2327_v9 }
  0x2c   : > { %1961 = vmatprep.mubr.msk.bf16.mxu1 %vm906_vm0, %v2215_v32  ;;  %300 = vst.msk [vmem:[#allocation2 + $0xb0] sm:$0xff] %vm277_vm2, %v2327_v9  ;;  %301 = vst.msk [vmem:[#allocation2 + $0xb8] sm:$0xff] %vm277_vm2, %v2327_v9 }
  0x2d   : > { %302 = vst.msk [vmem:[#allocation2 + $0xc0] sm:$0xff] %vm277_vm2, %v2327_v9  ;;  %303 = vst.msk [vmem:[#allocation2 + $0xc8] sm:$0xff] %vm277_vm2, %v2327_v9 }
  0x2e   : > { %304 = vst.msk [vmem:[#allocation2 + $0xd0] sm:$0xff] %vm277_vm2, %v2327_v9  ;;  %305 = vst.msk [vmem:[#allocation2 + $0xd8] sm:$0xff] %vm277_vm2, %v2327_v9 }
  0x2f   : > { %306 = vst.msk [vmem:[#allocation2 + $0xe0] sm:$0xff] %vm277_vm2, %v2327_v9  ;;  %307 = vst.msk [vmem:[#allocation2 + $0xe8] sm:$0xff] %vm277_vm2, %v2327_v9 }
  0x30   : > { %1000 = vmatmul.mubr.bf16.gmra.mrb[4].mxu0 %v2214_v33  ;;  %308 = vst.msk [vmem:[#allocation2 + $0xf0] sm:$0xff] %vm277_vm2, %v2327_v9  ;;  %309 = vst.msk [vmem:[#allocation2 + $0xf8] sm:$0xff] %vm277_vm2, %v2327_v9  ;;  %v310_v33 = vld [vmem:[#allocation2] sm:$0xff] }
  0x31   : > { %1007 = vmatprep.mubr.bf16.mxu0 %v2218_v34  ;;  %1542 = vst.msk [vmem:[%s2625_s5] sm:$0xff] %vm277_vm2, %v2327_v9 }
  0x33   : > { %1161 = vmatmul.mubr.bf16.gmra.mrb[4].mxu1 %v2217_v35 }
  0x34   : > { %1962 = vmatprep.mubr.msk.bf16.mxu1 %vm906_vm0, %v2221_v36 }
  0x38   : > { %1008 = vmatmul.mubr.bf16.gmra.mrb[8].mxu0 %v2220_v37 }
  0x39   : > { %1015 = vmatprep.mubr.bf16.mxu0 %v2224_v38  ;;  %v311_v38 = vld [vmem:[#allocation2 + $0x8] sm:$0xff] }
  0x3b   : > { %1169 = vmatmul.mubr.bf16.gmra.mrb[8].mxu1 %v2223_v39 }
  0x3c   : > { %1963 = vmatprep.mubr.msk.bf16.mxu1 %vm906_vm0, %v2227_v40 }
  0x40   : > { %1016 = vmatmul.mubr.bf16.gmra.mrb[12].mxu0 %v2226_v41 }
  0x41   : > { %1023 = vmatprep.mubr.bf16.mxu0 %v2230_v42 }
  0x43   : > { %1177 = vmatmul.mubr.bf16.gmra.mrb[12].mxu1 %v2229_v43 }
  0x44   : > { %1964 = vmatprep.mubr.msk.bf16.mxu1 %vm906_vm0, %v2233_v44 }
  0x48   : > { %1024 = vmatmul.mubr.bf16.gmra.mrb[16].mxu0 %v2232_v45 }
  0x49   : > { %1031 = vmatprep.mubr.bf16.mxu0 %v2236_v46 }
  0x4b   : > { %1185 = vmatmul.mubr.bf16.gmra.mrb[16].mxu1 %v2235_v47 }
  0x4c   : > { %1965 = vmatprep.mubr.msk.bf16.mxu1 %vm906_vm0, %v2239_v48 }
  0x50   : > { %1032 = vmatmul.mubr.bf16.gmra.mrb[20].mxu0 %v2238_v49  ;;  %v312_v49 = vld [vmem:[#allocation2 + $0x10] sm:$0xff] }
  0x51   : > { %1039 = vmatprep.mubr.bf16.mxu0 %v2242_v50 }
  0x53   : > { %1193 = vmatmul.mubr.bf16.gmra.mrb[20].mxu1 %v2241_v51 }
  0x54   : > { %1966 = vmatprep.mubr.msk.bf16.mxu1 %vm906_vm0, %v2245_v52 }
  0x58   : > { %1040 = vmatmul.mubr.bf16.gmra.mrb[24].mxu0 %v2244_v53 }
  0x59   : > { %1047 = vmatprep.mubr.bf16.mxu0 %v2248_v54  ;;  %v313_v54 = vld [vmem:[#allocation2 + $0x18] sm:$0xff] }
  0x5b   : > { %1201 = vmatmul.mubr.bf16.gmra.mrb[24].mxu1 %v2247_v55 }
  0x5c   : > { %1967 = vmatprep.mubr.msk.bf16.mxu1 %vm906_vm0, %v2251_v56 }
  0x60   : > { %1048 = vmatmul.mubr.bf16.gmra.mrb[28].mxu0 %v2250_v57 }
  0x61   : > { %1055 = vmatprep.mubr.bf16.mxu0 %v2254_v58 }
  0x63   : > { %1209 = vmatmul.mubr.bf16.gmra.mrb[28].mxu1 %v2253_v59 }
  0x64   : > { %1968 = vmatprep.mubr.msk.bf16.mxu1 %vm906_vm0, %v2257_v60 }
  0x68   : > { %1056 = vmatmul.mubr.bf16.gmra.mrb[32].mxu0 %v2256_v61 }
  0x69   : > { %1063 = vmatprep.mubr.bf16.mxu0 %v2260_v62 }
  0x6b   : > { %1217 = vmatmul.mubr.bf16.gmra.mrb[32].mxu1 %v2259_v63 }
  0x6c   : > { %1969 = vmatprep.mubr.msk.bf16.mxu1 %vm906_vm0, %v2263_v0 }
  0x70   : > { %1064 = vmatmul.mubr.bf16.gmra.mrb[36].mxu0 %v2262_v1 }
  0x71   : > { %1071 = vmatprep.mubr.bf16.mxu0 %v2266_v2 }
  0x73   : > { %1225 = vmatmul.mubr.bf16.gmra.mrb[36].mxu1 %v2265_v3 }
  0x74   : > { %1970 = vmatprep.mubr.msk.bf16.mxu1 %vm906_vm0, %v2269_v4 }
  0x78   : > { %1072 = vmatmul.mubr.bf16.gmra.mrb[40].mxu0 %v2268_v5 }
  0x79   : > { %1079 = vmatprep.mubr.bf16.mxu0 %v2272_v6 }
  0x7b   : > { %1233 = vmatmul.mubr.bf16.gmra.mrb[40].mxu1 %v2271_v7  ;;  %v314_v7 = vld [vmem:[#allocation2 + $0x20] sm:$0xff] }
  0x7c   : > { %1971 = vmatprep.mubr.msk.bf16.mxu1 %vm906_vm0, %v2275_v8 }
  0x80   : > { %1080 = vmatmul.mubr.bf16.gmra.mrb[44].mxu0 %v2274_v10 }
  0x81   : > { %1087 = vmatprep.mubr.bf16.mxu0 %v2278_v11  ;;  %v315_v11 = vld [vmem:[#allocation2 + $0x28] sm:$0xff] }
  0x83   : > { %1241 = vmatmul.mubr.bf16.gmra.mrb[44].mxu1 %v2277_v12 }
  0x84   : > { %1972 = vmatprep.mubr.msk.bf16.mxu1 %vm906_vm0, %v2281_v13 }
  0x88   : > { %1088 = vmatmul.mubr.bf16.gmra.mrb[48].mxu0 %v2280_v14 }
  0x89   : > { %1095 = vmatprep.mubr.bf16.mxu0 %v2284_v15 }
  0x8b   : > { %1249 = vmatmul.mubr.bf16.gmra.mrb[48].mxu1 %v2283_v16 }
  0x8c   : > { %1973 = vmatprep.mubr.msk.bf16.mxu1 %vm906_vm0, %v2287_v17 }
  0x90   : > { %1096 = vmatmul.mubr.bf16.gmra.mrb[52].mxu0 %v2286_v18 }
  0x91   : > { %1103 = vmatprep.mubr.bf16.mxu0 %v2290_v19 }
  0x93   : > { %1257 = vmatmul.mubr.bf16.gmra.mrb[52].mxu1 %v2289_v20 }
  0x94   : > { %1974 = vmatprep.mubr.msk.bf16.mxu1 %vm906_vm0, %v2293_v21 }
  0x98   : > { %1104 = vmatmul.mubr.bf16.gmra.mrb[56].mxu0 %v2292_v22 }
  0x99   : > { %1111 = vmatprep.mubr.bf16.mxu0 %v2296_v23 }
  0x9b   : > { %1265 = vmatmul.mubr.bf16.gmra.mrb[56].mxu1 %v2295_v24 }
  0x9c   : > { %1975 = vmatprep.mubr.msk.bf16.mxu1 %vm906_vm0, %v2299_v25 }
  0xa0   : > { %1112 = vmatmul.mubr.bf16.gmra.mrb[60].mxu0 %v2298_v26 }
  0xa3   : > { %1273 = vmatmul.mubr.bf16.gmra.mrb[60].mxu1 %v2301_v27  ;;  %v316_v27 = vld [vmem:[#allocation2 + $0x30] sm:$0xff] }
  0xfb   : > { %v2059_v28 = vpop.f32.mrb[0].mxu0 }
  0xfc   : > { %v2060_v29 = vpop.f32.mrb[1].mxu0 }
  0xfd   : > { %v2061_v30 = vadd.f32 %v2060_v29, %v2059_v28  ;;  %v2062_v31 = vpop.f32.mrb[2].mxu0 }
  0xfe   : > { %v2063_v32 = vpop.f32.mrb[3].mxu0  ;;  %v1154_v34 = vpop.f32.mrb[0].mxu1 }
  0xff   : > { %v2064_v35 = vadd.f32 %v2063_v32, %v2062_v31  ;;  %v1155_v36 = vadd.f32 %v2061_v30, %v1154_v34  ;;  %v1156_v37 = vpop.f32.mrb[1].mxu1  ;;  %v317_v30 = vld [vmem:[#allocation2 + $0x38] sm:$0xff] }
 0x100   : > { %v1157_v39 = vpop.f32.mrb[2].mxu1 }
 0x101   : > { %v1281_v40 = vadd.f32 %v1155_v36, %v310_v33  ;;  %v1158_v41 = vadd.f32 %v2064_v35, %v1157_v39  ;;  %v1159_v42 = vpop.f32.mrb[3].mxu1 }
 0x103   : > { %1314 = vst.msk [vmem:[#allocation2] sm:$0xff] %vm277_vm2, %v1281_v40  ;;  %v1282_v43 = vadd.f32 %v1158_v41, %v311_v38  ;;  %v2065_v44 = vpop.f32.mrb[4].mxu0 }
 0x104   : > { %v2066_v45 = vpop.f32.mrb[5].mxu0 }
 0x105   : > { %1315 = vst.msk [vmem:[#allocation2 + $0x8] sm:$0xff] %vm277_vm2, %v1282_v43  ;;  %v2067_v46 = vadd.f32 %v2066_v45, %v2065_v44  ;;  %v2068_v47 = vpop.f32.mrb[6].mxu0 }
 0x106   : > { %v2069_v48 = vpop.f32.mrb[7].mxu0  ;;  %v1162_v50 = vpop.f32.mrb[4].mxu1 }
 0x107   : > { %v2070_v51 = vadd.f32 %v2069_v48, %v2068_v47  ;;  %v1163_v52 = vadd.f32 %v2067_v46, %v1162_v50  ;;  %v1164_v53 = vpop.f32.mrb[5].mxu1  ;;  %v318_v47 = vld [vmem:[#allocation2 + $0x40] sm:$0xff]  ;;  %v319_v50 = vld [vmem:[#allocation2 + $0x48] sm:$0xff] }
 0x108   : > { %v1165_v55 = vpop.f32.mrb[6].mxu1 }
 0x109   : > { %v1283_v56 = vadd.f32 %v1163_v52, %v312_v49  ;;  %v1166_v57 = vadd.f32 %v2070_v51, %v1165_v55  ;;  %v1167_v58 = vpop.f32.mrb[7].mxu1 }
 0x10a   : > { %v2615_v59 = vld [vmem:[#allocation2] sm:$0xff] }
 0x10b   : > { %v2011_v60 = vpack.c.bf16 %v2615_v59, %v2615_v59  ;;  %1316 = vst.msk [vmem:[#allocation2 + $0x10] sm:$0xff] %vm277_vm2, %v1283_v56  ;;  %v1284_v61 = vadd.f32 %v1166_v57, %v313_v54  ;;  %v2071_v62 = vpop.f32.mrb[8].mxu0 }
 0x10c   : > { %v2620_v63 = vld [vmem:[#allocation2 + $0x8] sm:$0xff]  ;;  %v2072_v0 = vpop.f32.mrb[9].mxu0 }
 0x10d   : > { %1510 = vst.msk [vmem:[%s2613_s29] sm:$0xf] %vm1509_vm3, %v2011_v60  ;;  %v2012_v1 = vpack.c.bf16 %v2620_v63, %v2620_v63  ;;  %v2074_v2 = vpop.f32.mrb[10].mxu0  ;;  %v2073_v3 = vadd.f32 %v2072_v0, %v2071_v62 }
 0x10e   : > { %1317 = vst.msk [vmem:[#allocation2 + $0x18] sm:$0xff] %vm277_vm2, %v1284_v61  ;;  %v2075_v4 = vpop.f32.mrb[11].mxu0  ;;  %v1170_v5 = vpop.f32.mrb[8].mxu1 }
 0x10f   : > { %1511 = vst.msk [vmem:[%s2613_s29 + $0x4] sm:$0xf] %vm1509_vm3, %v2012_v1  ;;  %v2076_v6 = vadd.f32 %v2075_v4, %v2074_v2  ;;  %v1172_v8 = vpop.f32.mrb[9].mxu1  ;;  %v1171_v10 = vadd.f32 %v2073_v3, %v1170_v5  ;;  %v320_v5 = vld [vmem:[#allocation2 + $0x50] sm:$0xff] }
 0x110   : > { %v1173_v12 = vpop.f32.mrb[10].mxu1  ;;  %v321_v8 = vld [vmem:[#allocation2 + $0x58] sm:$0xff] }
 0x111   : > { %v1174_v13 = vadd.f32 %v2076_v6, %v1173_v12  ;;  %v1175_v14 = vpop.f32.mrb[11].mxu1  ;;  %v1285_v16 = vadd.f32 %v1171_v10, %v314_v7 }
 0x112   : > { %v2637_v15 = vld [vmem:[#allocation2 + $0x10] sm:$0xff]  ;;  %v1614_v14 = vmul.f32 %v2615_v59, %v2615_v59 }
 0x113   : > { %v2013_v9 = vpack.c.bf16 %v2637_v15, %v2637_v15  ;;  %v1286_v17 = vadd.f32 %v1174_v13, %v315_v11  ;;  %v2077_v18 = vpop.f32.mrb[12].mxu0  ;;  %1318 = vst.msk [vmem:[#allocation2 + $0x20] sm:$0xff] %vm277_vm2, %v1285_v16  ;;  %v1615_v11 = vmul.f32 %v2620_v63, %v2620_v63 }
 0x114   : > { %v2078_v20 = vpop.f32.mrb[13].mxu0 }
 0x115   : > { %v2641_v19 = vld [vmem:[#allocation2 + $0x18] sm:$0xff]  ;;  %1512 = vst.msk [vmem:[%s2613_s29 + $0x8] sm:$0xf] %vm1509_vm3, %v2013_v9  ;;  %v2080_v22 = vpop.f32.mrb[14].mxu0  ;;  %v2079_v23 = vadd.f32 %v2078_v20, %v2077_v18  ;;  %v1616_v9 = vmul.f32 %v2637_v15, %v2637_v15 }
 0x116   : > { %v2014_v21 = vpack.c.bf16 %v2641_v19, %v2641_v19  ;;  %1319 = vst.msk [vmem:[#allocation2 + $0x28] sm:$0xff] %vm277_vm2, %v1286_v17  ;;  %v2081_v24 = vpop.f32.mrb[15].mxu0  ;;  %v1178_v25 = vpop.f32.mrb[12].mxu1 }
 0x117   : > { %v2082_v26 = vadd.f32 %v2081_v24, %v2080_v22  ;;  %v1180_v28 = vpop.f32.mrb[13].mxu1  ;;  %v1179_v29 = vadd.f32 %v2079_v23, %v1178_v25  ;;  %v1647_v25 = vsel %vm277_vm2, %v1615_v11, 0.0 }
 0x118   : > { %1513 = vst.msk [vmem:[%s2613_s29 + $0xc] sm:$0xf] %vm1509_vm3, %v2014_v21  ;;  %v1181_v31 = vpop.f32.mrb[14].mxu1  ;;  %v1544_v21 = vsel %vm277_vm2, %v2620_v63, 0.0  ;;  %v1543_v63 = vsel %vm277_vm2, %v2615_v59, 0.0  ;;  %v1646_v28 = vsel %vm277_vm2, %v1614_v14, 0.0 }
 0x119   : > { %v1182_v32 = vadd.f32 %v2082_v26, %v1181_v31  ;;  %v1183_v33 = vpop.f32.mrb[15].mxu1  ;;  %v1287_v34 = vadd.f32 %v1179_v29, %v316_v27  ;;  %v1546_v29 = vsel %vm277_vm2, %v2637_v15, 0.0  ;;  %v322_v59 = vld [vmem:[#allocation2 + $0x60] sm:$0xff]  ;;  %v325_v14 = vld [vmem:[#allocation2 + $0x78] sm:$0xff] }
 0x11a   : > { %v2651_v35 = vld [vmem:[#allocation2 + $0x20] sm:$0xff]  ;;  %v1545_v33 = vadd.f32 %v1544_v21, %v1543_v63 }
 0x11b   : > { %v1288_v36 = vadd.f32 %v1182_v32, %v317_v30  ;;  %v2083_v37 = vpop.f32.mrb[16].mxu0  ;;  %v2015_v38 = vpack.c.bf16 %v2651_v35, %v2651_v35  ;;  %1320 = vst.msk [vmem:[#allocation2 + $0x30] sm:$0xff] %vm277_vm2, %v1287_v34  ;;  %v1649_v34 = vsel %vm277_vm2, %v1616_v9, 0.0 }
 0x11c   : > { %v2084_v40 = vpop.f32.mrb[17].mxu0 }
 0x11d   : > { %v2655_v39 = vld [vmem:[#allocation2 + $0x28] sm:$0xff]  ;;  %1321 = vst.msk [vmem:[#allocation2 + $0x38] sm:$0xff] %vm277_vm2, %v1288_v36  ;;  %v2086_v42 = vpop.f32.mrb[18].mxu0  ;;  %v2085_v43 = vadd.f32 %v2084_v40, %v2083_v37  ;;  %v1617_v36 = vmul.f32 %v2641_v19, %v2641_v19  ;;  %v1648_v40 = vadd.f32 %v1647_v25, %v1646_v28 }
 0x11e   : > { %v2016_v41 = vpack.c.bf16 %v2655_v39, %v2655_v39  ;;  %1514 = vst.msk [vmem:[%s2613_s29 + $0x10] sm:$0xf] %vm1509_vm3, %v2015_v38  ;;  %v2087_v44 = vpop.f32.mrb[19].mxu0  ;;  %v1186_v45 = vpop.f32.mrb[16].mxu1 }
 0x11f   : > { %v2088_v46 = vadd.f32 %v2087_v44, %v2086_v42  ;;  %v1188_v48 = vpop.f32.mrb[17].mxu1  ;;  %v1187_v49 = vadd.f32 %v2085_v43, %v1186_v45  ;;  %v323_v42 = vld [vmem:[#allocation2 + $0x68] sm:$0xff]  ;;  %v1547_v43 = vadd.f32 %v1546_v29, %v1545_v33  ;;  %v1618_v44 = vmul.f32 %v2651_v35, %v2651_v35 }
 0x120   : > { %1515 = vst.msk [vmem:[%s2613_s29 + $0x14] sm:$0xf] %vm1509_vm3, %v2016_v41  ;;  %v1189_v51 = vpop.f32.mrb[18].mxu1  ;;  %v1548_v48 = vsel %vm277_vm2, %v2641_v19, 0.0 }
 0x121   : > { %v1190_v52 = vadd.f32 %v2088_v46, %v1189_v51  ;;  %v1191_v53 = vpop.f32.mrb[19].mxu1  ;;  %v1289_v54 = vadd.f32 %v1187_v49, %v318_v47  ;;  %v1650_v47 = vadd.f32 %v1649_v34, %v1648_v40 }
 0x122   : > { %v2665_v55 = vld [vmem:[#allocation2 + $0x30] sm:$0xff] }
 0x123   : > { %v1290_v56 = vadd.f32 %v1190_v52, %v319_v50  ;;  %v2089_v57 = vpop.f32.mrb[20].mxu0  ;;  %v2017_v58 = vpack.c.bf16 %v2665_v55, %v2665_v55  ;;  %1322 = vst.msk [vmem:[#allocation2 + $0x40] sm:$0xff] %vm277_vm2, %v1289_v54  ;;  %v1651_v50 = vsel %vm277_vm2, %v1617_v36, 0.0  ;;  %v1550_v54 = vsel %vm277_vm2, %v2651_v35, 0.0 }
 0x124   : > { %v2669_v60 = vld [vmem:[#allocation2 + $0x38] sm:$0xff]  ;;  %v2090_v61 = vpop.f32.mrb[21].mxu0  ;;  %v1554_v21 = vsel %vm277_vm2, %v2665_v55, 0.0 }
 0x125   : > { %v2018_v62 = vpack.c.bf16 %v2669_v60, %v2669_v60  ;;  %1323 = vst.msk [vmem:[#allocation2 + $0x48] sm:$0xff] %vm277_vm2, %v1290_v56  ;;  %v2092_v0 = vpop.f32.mrb[22].mxu0  ;;  %v2091_v1 = vadd.f32 %v2090_v61, %v2089_v57  ;;  %v1653_v61 = vsel %vm277_vm2, %v1618_v44, 0.0 }
 0x126   : > { %1516 = vst.msk [vmem:[%s2613_s29 + $0x18] sm:$0xf] %vm1509_vm3, %v2017_v58  ;;  %v2093_v2 = vpop.f32.mrb[23].mxu0  ;;  %v1194_v3 = vpop.f32.mrb[20].mxu1  ;;  %v1549_v58 = vadd.f32 %v1548_v48, %v1547_v43 }
 0x127   : > { %1517 = vst.msk [vmem:[%s2613_s29 + $0x1c] sm:$0xf] %vm1509_vm3, %v2018_v62  ;;  %v2094_v4 = vadd.f32 %v2093_v2, %v2092_v0  ;;  %v1196_v6 = vpop.f32.mrb[21].mxu1  ;;  %v1195_v7 = vadd.f32 %v2091_v1, %v1194_v3  ;;  %v1619_v62 = vmul.f32 %v2655_v39, %v2655_v39  ;;  %v1652_v1 = vadd.f32 %v1651_v50, %v1650_v47 }
 0x128   : > { %v1197_v10 = vpop.f32.mrb[22].mxu1  ;;  %v1620_v6 = vmul.f32 %v2665_v55, %v2665_v55 }
 0x129   : > { %v1198_v12 = vadd.f32 %v2094_v4, %v1197_v10  ;;  %v1199_v13 = vpop.f32.mrb[23].mxu1  ;;  %v1291_v16 = vadd.f32 %v1195_v7, %v320_v5  ;;  %v1551_v5 = vadd.f32 %v1550_v54, %v1549_v58  ;;  %v1654_v11 = vadd.f32 %v1653_v61, %v1652_v1 }
 0x12a   : > { %v2685_v17 = vld [vmem:[#allocation2 + $0x40] sm:$0xff]  ;;  %v1655_v9 = vsel %vm277_vm2, %v1619_v62, 0.0  ;;  %v1657_v25 = vsel %vm277_vm2, %v1620_v6, 0.0 }
 0x12b   : > { %v1292_v18 = vadd.f32 %v1198_v12, %v321_v8  ;;  %v2095_v20 = vpop.f32.mrb[24].mxu0  ;;  %v2019_v22 = vpack.c.bf16 %v2685_v17, %v2685_v17  ;;  %1324 = vst.msk [vmem:[#allocation2 + $0x50] sm:$0xff] %vm277_vm2, %v1291_v16  ;;  %v324_v8 = vld [vmem:[#allocation2 + $0x70] sm:$0xff]  ;;  %v1552_v12 = vsel %vm277_vm2, %v2655_v39, 0.0  ;;  %v1656_v28 = vadd.f32 %v1655_v9, %v1654_v11 }
 0x12c   : > { %v2691_v23 = vld [vmem:[#allocation2 + $0x48] sm:$0xff]  ;;  %v2096_v24 = vpop.f32.mrb[25].mxu0  ;;  %v1558_v44 = vsel %vm277_vm2, %v2685_v17, 0.0 }
 0x12d   : > { %v2020_v26 = vpack.c.bf16 %v2691_v23, %v2691_v23  ;;  %1325 = vst.msk [vmem:[#allocation2 + $0x58] sm:$0xff] %vm277_vm2, %v1292_v18  ;;  %v2098_v27 = vpop.f32.mrb[26].mxu0  ;;  %v2097_v30 = vadd.f32 %v2096_v24, %v2095_v20  ;;  %v1553_v24 = vadd.f32 %v1552_v12, %v1551_v5  ;;  %v1658_v36 = vadd.f32 %v1657_v25, %v1656_v28 }
 0x12e   : > { %1518 = vst.msk [vmem:[%s2613_s29 + $0x20] sm:$0xf] %vm1509_vm3, %v2019_v22  ;;  %v2099_v31 = vpop.f32.mrb[27].mxu0  ;;  %v1202_v32 = vpop.f32.mrb[24].mxu1 }
 0x12f   : > { %1519 = vst.msk [vmem:[%s2613_s29 + $0x24] sm:$0xf] %vm1509_vm3, %v2020_v26  ;;  %v2100_v37 = vadd.f32 %v2099_v31, %v2098_v27  ;;  %v1204_v38 = vpop.f32.mrb[25].mxu1  ;;  %v1203_v41 = vadd.f32 %v2097_v30, %v1202_v32  ;;  %v1621_v26 = vmul.f32 %v2669_v60, %v2669_v60  ;;  %v1555_v31 = vadd.f32 %v1554_v21, %v1553_v24 }
 0x130   : > { %v1205_v15 = vpop.f32.mrb[26].mxu1  ;;  %v1622_v32 = vmul.f32 %v2685_v17, %v2685_v17 }
 0x131   : > { %v1206_v45 = vadd.f32 %v2100_v37, %v1205_v15  ;;  %v1207_v46 = vpop.f32.mrb[27].mxu1  ;;  %v1293_v49 = vadd.f32 %v1203_v41, %v322_v59  ;;  %v1556_v37 = vsel %vm277_vm2, %v2669_v60, 0.0  ;;  %v1659_v41 = vsel %vm277_vm2, %v1621_v26, 0.0  ;;  %v326_v15 = vld [vmem:[#allocation2 + $0x80] sm:$0xff] }
 0x132   : > { %v2715_v51 = vld [vmem:[#allocation2 + $0x50] sm:$0xff]  ;;  %v327_v46 = vld [vmem:[#allocation2 + $0x88] sm:$0xff]  ;;  %v1557_v48 = vadd.f32 %v1556_v37, %v1555_v31  ;;  %v1661_v60 = vsel %vm277_vm2, %v1622_v32, 0.0 }
 0x133   : > { %v1294_v52 = vadd.f32 %v1206_v45, %v323_v42  ;;  %v2101_v53 = vpop.f32.mrb[28].mxu0  ;;  %v2021_v56 = vpack.c.bf16 %v2715_v51, %v2715_v51  ;;  %1326 = vst.msk [vmem:[#allocation2 + $0x60] sm:$0xff] %vm277_vm2, %v1293_v49  ;;  %v1623_v49 = vmul.f32 %v2691_v23, %v2691_v23 }
 0x134   : > { %v2721_v57 = vld [vmem:[#allocation2 + $0x58] sm:$0xff]  ;;  %v2102_v19 = vpop.f32.mrb[29].mxu0 }
 0x135   : > { %v2022_v0 = vpack.c.bf16 %v2721_v57, %v2721_v57  ;;  %1327 = vst.msk [vmem:[#allocation2 + $0x68] sm:$0xff] %vm277_vm2, %v1294_v52  ;;  %v2104_v35 = vpop.f32.mrb[30].mxu0  ;;  %v2103_v2 = vadd.f32 %v2102_v19, %v2101_v53  ;;  %v1660_v53 = vadd.f32 %v1659_v41, %v1658_v36  ;;  %v1624_v19 = vmul.f32 %v2715_v51, %v2715_v51 }
 0x136   : > { %1520 = vst.msk [vmem:[%s2613_s29 + $0x28] sm:$0xf] %vm1509_vm3, %v2021_v56  ;;  %v2105_v3 = vpop.f32.mrb[31].mxu0  ;;  %v1210_v4 = vpop.f32.mrb[28].mxu1  ;;  %v1559_v56 = vadd.f32 %v1558_v44, %v1557_v48  ;;  %v1625_v12 = vmul.f32 %v2721_v57, %v2721_v57 }
 0x137   : > { %1521 = vst.msk [vmem:[%s2613_s29 + $0x2c] sm:$0xf] %vm1509_vm3, %v2022_v0  ;;  %v2106_v7 = vadd.f32 %v2105_v3, %v2104_v35  ;;  %v1212_v10 = vpop.f32.mrb[29].mxu1  ;;  %v1211_v13 = vadd.f32 %v2103_v2, %v1210_v4  ;;  %v1662_v62 = vadd.f32 %v1661_v60, %v1660_v53  ;;  %v1560_v0 = vsel %vm277_vm2, %v2691_v23, 0.0 }
 0x138   : > { %v1213_v16 = vpop.f32.mrb[30].mxu1  ;;  %v1663_v3 = vsel %vm277_vm2, %v1623_v49, 0.0  ;;  %v1562_v23 = vsel %vm277_vm2, %v2715_v51, 0.0  ;;  %v1561_v10 = vadd.f32 %v1560_v0, %v1559_v56  ;;  %v1665_v11 = vsel %vm277_vm2, %v1624_v19, 0.0 }
 0x139   : > { %v1214_v18 = vadd.f32 %v2106_v7, %v1213_v16  ;;  %v1215_v20 = vpop.f32.mrb[31].mxu1  ;;  %v1295_v22 = vadd.f32 %v1211_v13, %v324_v8  ;;  %v1664_v9 = vadd.f32 %v1663_v3, %v1662_v62  ;;  %v1667_v28 = vsel %vm277_vm2, %v1625_v12, 0.0 }
 0x13a   : > { %v2744_v27 = vld [vmem:[#allocation2 + $0x60] sm:$0xff]  ;;  %v329_v20 = vld [vmem:[#allocation2 + $0x98] sm:$0xff]  ;;  %v1563_v21 = vadd.f32 %v1562_v23, %v1561_v10 }
 0x13b   : > { %v1296_v39 = vadd.f32 %v1214_v18, %v325_v14  ;;  %v2107_v63 = vpop.f32.mrb[32].mxu0  ;;  %v2023_v29 = vpack.c.bf16 %v2744_v27, %v2744_v27  ;;  %1328 = vst.msk [vmem:[#allocation2 + $0x70] sm:$0xff] %vm277_vm2, %v1295_v22  ;;  %v328_v14 = vld [vmem:[#allocation2 + $0x90] sm:$0xff]  ;;  %v1626_v22 = vmul.f32 %v2744_v27, %v2744_v27  ;;  %v1666_v26 = vadd.f32 %v1665_v11, %v1664_v9 }
 0x13c   : > { %v2748_v30 = vld [vmem:[#allocation2 + $0x68] sm:$0xff]  ;;  %v2108_v55 = vpop.f32.mrb[33].mxu0  ;;  %v1566_v32 = vsel %vm277_vm2, %v2744_v27, 0.0 }
 0x13d   : > { %v2024_v33 = vpack.c.bf16 %v2748_v30, %v2748_v30  ;;  %1329 = vst.msk [vmem:[#allocation2 + $0x78] sm:$0xff] %vm277_vm2, %v1296_v39  ;;  %v2110_v34 = vpop.f32.mrb[34].mxu0  ;;  %v2109_v59 = vadd.f32 %v2108_v55, %v2107_v63  ;;  %v1564_v39 = vsel %vm277_vm2, %v2721_v57, 0.0  ;;  %v1669_v57 = vsel %vm277_vm2, %v1626_v22, 0.0  ;;  %v333_v22 = vld [vmem:[#allocation2 + $0xb8] sm:$0xff] }
 0x13e   : > { %1522 = vst.msk [vmem:[%s2613_s29 + $0x30] sm:$0xf] %vm1509_vm3, %v2023_v29  ;;  %v2111_v38 = vpop.f32.mrb[35].mxu0  ;;  %v1218_v40 = vpop.f32.mrb[32].mxu1  ;;  %v1565_v37 = vadd.f32 %v1564_v39, %v1563_v21  ;;  %v1668_v27 = vadd.f32 %v1667_v28, %v1666_v26  ;;  %v1568_v60 = vsel %vm277_vm2, %v2748_v30, 0.0 }
 0x13f   : > { %1523 = vst.msk [vmem:[%s2613_s29 + $0x34] sm:$0xf] %vm1509_vm3, %v2024_v33  ;;  %v2112_v42 = vadd.f32 %v2111_v38, %v2110_v34  ;;  %v1220_v43 = vpop.f32.mrb[33].mxu1  ;;  %v1219_v45 = vadd.f32 %v2109_v59, %v1218_v40  ;;  %v1627_v59 = vmul.f32 %v2748_v30, %v2748_v30 }
 0x140   : > { %v1221_v47 = vpop.f32.mrb[34].mxu1  ;;  %v1567_v43 = vadd.f32 %v1566_v32, %v1565_v37  ;;  %v1670_v48 = vadd.f32 %v1669_v57, %v1668_v27 }
 0x141   : > { %v1222_v50 = vadd.f32 %v2112_v42, %v1221_v47  ;;  %v1223_v52 = vpop.f32.mrb[35].mxu1  ;;  %v1297_v54 = vadd.f32 %v1219_v45, %v326_v15  ;;  %v1671_v53 = vsel %vm277_vm2, %v1627_v59, 0.0 }
 0x142   : > { %v2770_v58 = vld [vmem:[#allocation2 + $0x70] sm:$0xff]  ;;  %v1672_v3 = vadd.f32 %v1671_v53, %v1670_v48  ;;  %v335_v53 = vld [vmem:[#allocation2 + $0xc8] sm:$0xff] }
 0x143   : > { %v1298_v17 = vadd.f32 %v1222_v50, %v327_v46  ;;  %v2113_v61 = vpop.f32.mrb[36].mxu0  ;;  %v2025_v35 = vpack.c.bf16 %v2770_v58, %v2770_v58  ;;  %1330 = vst.msk [vmem:[#allocation2 + $0x80] sm:$0xff] %vm277_vm2, %v1297_v54  ;;  %v1628_v44 = vmul.f32 %v2770_v58, %v2770_v58  ;;  %v330_v46 = vld [vmem:[#allocation2 + $0xa0] sm:$0xff]  ;;  %v331_v50 = vld [vmem:[#allocation2 + $0xa8] sm:$0xff]  ;;  %v1570_v19 = vsel %vm277_vm2, %v2770_v58, 0.0 }
 0x144   : > { %v2776_v1 = vld [vmem:[#allocation2 + $0x78] sm:$0xff]  ;;  %v2114_v2 = vpop.f32.mrb[37].mxu0 }
 0x145   : > { %v2026_v4 = vpack.c.bf16 %v2776_v1, %v2776_v1  ;;  %1331 = vst.msk [vmem:[#allocation2 + $0x88] sm:$0xff] %vm277_vm2, %v1298_v17  ;;  %v2116_v5 = vpop.f32.mrb[38].mxu0  ;;  %v2115_v6 = vadd.f32 %v2114_v2, %v2113_v61  ;;  %v1569_v61 = vadd.f32 %v1568_v60, %v1567_v43  ;;  %v1673_v62 = vsel %vm277_vm2, %v1628_v44, 0.0  ;;  %v334_v60 = vld [vmem:[#allocation2 + $0xc0] sm:$0xff] }
 0x146   : > { %1524 = vst.msk [vmem:[%s2613_s29 + $0x38] sm:$0xf] %vm1509_vm3, %v2025_v35  ;;  %v2117_v7 = vpop.f32.mrb[39].mxu0  ;;  %v1226_v8 = vpop.f32.mrb[36].mxu1  ;;  %v1629_v0 = vmul.f32 %v2776_v1, %v2776_v1  ;;  %v1674_v10 = vadd.f32 %v1673_v62, %v1672_v3  ;;  %v1572_v11 = vsel %vm277_vm2, %v2776_v1, 0.0 }
 0x147   : > { %1525 = vst.msk [vmem:[%s2613_s29 + $0x3c] sm:$0xf] %vm1509_vm3, %v2026_v4  ;;  %v2118_v13 = vadd.f32 %v2117_v7, %v2116_v5  ;;  %v1228_v16 = vpop.f32.mrb[37].mxu1  ;;  %v1227_v18 = vadd.f32 %v2115_v6, %v1226_v8  ;;  %v1571_v58 = vadd.f32 %v1570_v19, %v1569_v61 }
 0x148   : > { %v1229_v51 = vpop.f32.mrb[38].mxu1  ;;  %v1675_v16 = vsel %vm277_vm2, %v1629_v0, 0.0 }
 0x149   : > { %v1230_v24 = vadd.f32 %v2118_v13, %v1229_v51  ;;  %v1231_v25 = vpop.f32.mrb[39].mxu1  ;;  %v1299_v63 = vadd.f32 %v1227_v18, %v328_v14  ;;  %v332_v18 = vld [vmem:[#allocation2 + $0xb0] sm:$0xff]  ;;  %v1676_v28 = vadd.f32 %v1675_v16, %v1674_v10 }
 0x14a   : > { %v1365_v29 = vld [vmem:[#allocation2 + $0x80] sm:$0xff]  ;;  %v1573_v25 = vadd.f32 %v1572_v11, %v1571_v58 }
 0x14b   : > { %v1300_v55 = vadd.f32 %v1230_v24, %v329_v20  ;;  %v2119_v31 = vpop.f32.mrb[40].mxu0  ;;  %v2027_v33 = vpack.c.bf16 %v1365_v29, %v1365_v29  ;;  %1332 = vst.msk [vmem:[#allocation2 + $0x90] sm:$0xff] %vm277_vm2, %v1299_v63  ;;  %v1630_v6 = vmul.f32 %v1365_v29, %v1365_v29  ;;  %v1574_v51 = vsel %vm277_vm2, %v1365_v29, 0.0 }
 0x14c   : > { %v2799_v34 = vld [vmem:[#allocation2 + $0x88] sm:$0xff]  ;;  %v2120_v36 = vpop.f32.mrb[41].mxu0 }
 0x14d   : > { %v2028_v38 = vpack.c.bf16 %v2799_v34, %v2799_v34  ;;  %1333 = vst.msk [vmem:[#allocation2 + $0x98] sm:$0xff] %vm277_vm2, %v1300_v55  ;;  %v2122_v40 = vpop.f32.mrb[42].mxu0  ;;  %v2121_v41 = vadd.f32 %v2120_v36, %v2119_v31  ;;  %v1677_v1 = vsel %vm277_vm2, %v1630_v6, 0.0  ;;  %v1631_v26 = vmul.f32 %v2799_v34, %v2799_v34 }
 0x14e   : > { %1526 = vst.msk [vmem:[%s2613_s29 + $0x40] sm:$0xf] %vm1509_vm3, %v2027_v33  ;;  %v2123_v42 = vpop.f32.mrb[43].mxu0  ;;  %v1234_v15 = vpop.f32.mrb[40].mxu1  ;;  %v1575_v31 = vadd.f32 %v1574_v51, %v1573_v25  ;;  %v1678_v29 = vadd.f32 %v1677_v1, %v1676_v28  ;;  %v1576_v57 = vsel %vm277_vm2, %v2799_v34, 0.0 }
 0x14f   : > { %1527 = vst.msk [vmem:[%s2613_s29 + $0x44] sm:$0xf] %vm1509_vm3, %v2028_v38  ;;  %v2124_v45 = vadd.f32 %v2123_v42, %v2122_v40  ;;  %v1236_v47 = vpop.f32.mrb[41].mxu1  ;;  %v1235_v49 = vadd.f32 %v2121_v41, %v1234_v15  ;;  %v1679_v27 = vsel %vm277_vm2, %v1631_v26, 0.0  ;;  %v337_v26 = vld [vmem:[#allocation2 + $0xd8] sm:$0xff] }
 0x150   : > { %v1237_v52 = vpop.f32.mrb[42].mxu1  ;;  %v1577_v34 = vadd.f32 %v1576_v57, %v1575_v31 }
 0x151   : > { %v1238_v54 = vadd.f32 %v2124_v45, %v1237_v52  ;;  %v1239_v56 = vpop.f32.mrb[43].mxu1  ;;  %v1301_v17 = vadd.f32 %v1235_v49, %v330_v46 }
 0x152   : > { %v1367_v35 = vld [vmem:[#allocation2 + $0x90] sm:$0xff] }
 0x153   : > { %v1302_v30 = vadd.f32 %v1238_v54, %v331_v50  ;;  %v2125_v2 = vpop.f32.mrb[44].mxu0  ;;  %v2029_v4 = vpack.c.bf16 %v1367_v35, %v1367_v35  ;;  %1334 = vst.msk [vmem:[#allocation2 + $0xa0] sm:$0xff] %vm277_vm2, %v1301_v17  ;;  %v1632_v32 = vmul.f32 %v1367_v35, %v1367_v35  ;;  %v1578_v15 = vsel %vm277_vm2, %v1367_v35, 0.0 }
 0x154   : > { %v2822_v5 = vld [vmem:[#allocation2 + $0x98] sm:$0xff]  ;;  %v2126_v23 = vpop.f32.mrb[45].mxu0  ;;  %v1680_v50 = vadd.f32 %v1679_v27, %v1678_v29  ;;  %v1579_v56 = vadd.f32 %v1578_v15, %v1577_v34 }
 0x155   : > { %v2030_v7 = vpack.c.bf16 %v2822_v5, %v2822_v5  ;;  %1335 = vst.msk [vmem:[#allocation2 + $0xa8] sm:$0xff] %vm277_vm2, %v1302_v30  ;;  %v2128_v8 = vpop.f32.mrb[46].mxu0  ;;  %v2127_v12 = vadd.f32 %v2126_v23, %v2125_v2  ;;  %v1681_v46 = vsel %vm277_vm2, %v1632_v32, 0.0  ;;  %v1633_v47 = vmul.f32 %v2822_v5, %v2822_v5 }
 0x156   : > { %1528 = vst.msk [vmem:[%s2613_s29 + $0x48] sm:$0xf] %vm1509_vm3, %v2029_v4  ;;  %v2129_v13 = vpop.f32.mrb[47].mxu0  ;;  %v1242_v14 = vpop.f32.mrb[44].mxu1  ;;  %v1682_v62 = vadd.f32 %v1681_v46, %v1680_v50  ;;  %v1580_v0 = vsel %vm277_vm2, %v2822_v5, 0.0  ;;  %v338_v50 = vld [vmem:[#allocation2 + $0xe0] sm:$0xff] }
 0x157   : > { %1529 = vst.msk [vmem:[%s2613_s29 + $0x4c] sm:$0xf] %vm1509_vm3, %v2030_v7  ;;  %v2130_v9 = vadd.f32 %v2129_v13, %v2128_v8  ;;  %v1244_v20 = vpop.f32.mrb[45].mxu1  ;;  %v1243_v21 = vadd.f32 %v2127_v12, %v1242_v14  ;;  %v1683_v30 = vsel %vm277_vm2, %v1633_v47, 0.0  ;;  %v1581_v8 = vadd.f32 %v1580_v0, %v1579_v56  ;;  %v339_v56 = vld [vmem:[#allocation2 + $0xe8] sm:$0xff] }
 0x158   : > { %v1245_v24 = vpop.f32.mrb[46].mxu1  ;;  %v1684_v13 = vadd.f32 %v1683_v30, %v1682_v62 }
 0x159   : > { %v1246_v39 = vadd.f32 %v2130_v9, %v1245_v24  ;;  %v1247_v63 = vpop.f32.mrb[47].mxu1  ;;  %v1303_v55 = vadd.f32 %v1243_v21, %v332_v18  ;;  %v336_v21 = vld [vmem:[#allocation2 + $0xd0] sm:$0xff] }
 0x15a   : > { %v1369_v33 = vld [vmem:[#allocation2 + $0xa0] sm:$0xff] }
 0x15b   : > { %v1304_v36 = vadd.f32 %v1246_v39, %v333_v22  ;;  %v2131_v37 = vpop.f32.mrb[48].mxu0  ;;  %v2031_v59 = vpack.c.bf16 %v1369_v33, %v1369_v33  ;;  %1336 = vst.msk [vmem:[#allocation2 + $0xb0] sm:$0xff] %vm277_vm2, %v1303_v55  ;;  %v1634_v19 = vmul.f32 %v1369_v33, %v1369_v33  ;;  %v1582_v23 = vsel %vm277_vm2, %v1369_v33, 0.0 }
 0x15c   : > { %v1370_v38 = vld [vmem:[#allocation2 + $0xa8] sm:$0xff]  ;;  %v2132_v40 = vpop.f32.mrb[49].mxu0  ;;  %v1583_v18 = vadd.f32 %v1582_v23, %v1581_v8 }
 0x15d   : > { %v2032_v41 = vpack.c.bf16 %v1370_v38, %v1370_v38  ;;  %1337 = vst.msk [vmem:[#allocation2 + $0xb8] sm:$0xff] %vm277_vm2, %v1304_v36  ;;  %v2134_v42 = vpop.f32.mrb[50].mxu0  ;;  %v2133_v43 = vadd.f32 %v2132_v40, %v2131_v37  ;;  %v1685_v10 = vsel %vm277_vm2, %v1634_v19, 0.0  ;;  %v1635_v11 = vmul.f32 %v1370_v38, %v1370_v38 }
 0x15e   : > { %1530 = vst.msk [vmem:[%s2613_s29 + $0x50] sm:$0xf] %vm1509_vm3, %v2031_v59  ;;  %v2135_v44 = vpop.f32.mrb[51].mxu0  ;;  %v1250_v45 = vpop.f32.mrb[48].mxu1  ;;  %v1686_v24 = vadd.f32 %v1685_v10, %v1684_v13  ;;  %v1584_v25 = vsel %vm277_vm2, %v1370_v38, 0.0 }
 0x15f   : > { %1531 = vst.msk [vmem:[%s2613_s29 + $0x54] sm:$0xf] %vm1509_vm3, %v2032_v41  ;;  %v2136_v48 = vadd.f32 %v2135_v44, %v2134_v42  ;;  %v1252_v49 = vpop.f32.mrb[49].mxu1  ;;  %v1251_v52 = vadd.f32 %v2133_v43, %v1250_v45  ;;  %v1687_v63 = vsel %vm277_vm2, %v1635_v11, 0.0  ;;  %v1585_v33 = vadd.f32 %v1584_v25, %v1583_v18  ;;  %v340_v25 = vld [vmem:[#allocation2 + $0xf0] sm:$0xff] }
 0x160   : > { %v1253_v54 = vpop.f32.mrb[50].mxu1  ;;  %v1688_v40 = vadd.f32 %v1687_v63, %v1686_v24  ;;  %v341_v63 = vld [vmem:[#allocation2 + $0xf8] sm:$0xff] }
 0x161   : > { %v1254_v17 = vadd.f32 %v2136_v48, %v1253_v54  ;;  %v1255_v61 = vpop.f32.mrb[51].mxu1  ;;  %v1305_v35 = vadd.f32 %v1251_v52, %v334_v60 }
 0x162   : > { %v1371_v2 = vld [vmem:[#allocation2 + $0xb0] sm:$0xff] }
 0x163   : > { %v1306_v3 = vadd.f32 %v1254_v17, %v335_v53  ;;  %v2137_v4 = vpop.f32.mrb[52].mxu0  ;;  %v2033_v58 = vpack.c.bf16 %v1371_v2, %v1371_v2  ;;  %1338 = vst.msk [vmem:[#allocation2 + $0xc0] sm:$0xff] %vm277_vm2, %v1305_v35  ;;  %v1636_v20 = vmul.f32 %v1371_v2, %v1371_v2  ;;  %v1586_v31 = vsel %vm277_vm2, %v1371_v2, 0.0 }
 0x164   : > { %v1372_v6 = vld [vmem:[#allocation2 + $0xb8] sm:$0xff]  ;;  %v2138_v7 = vpop.f32.mrb[53].mxu0  ;;  %v1587_v42 = vadd.f32 %v1586_v31, %v1585_v33 }
 0x165   : > { %v2034_v5 = vpack.c.bf16 %v1372_v6, %v1372_v6  ;;  %1339 = vst.msk [vmem:[#allocation2 + $0xc8] sm:$0xff] %vm277_vm2, %v1306_v3  ;;  %v2140_v12 = vpop.f32.mrb[54].mxu0  ;;  %v2139_v14 = vadd.f32 %v2138_v7, %v2137_v4  ;;  %v1689_v36 = vsel %vm277_vm2, %v1636_v20, 0.0  ;;  %v1637_v37 = vmul.f32 %v1372_v6, %v1372_v6 }
 0x166   : > { %1532 = vst.msk [vmem:[%s2613_s29 + $0x58] sm:$0xf] %vm1509_vm3, %v2033_v58  ;;  %v2141_v16 = vpop.f32.mrb[55].mxu0  ;;  %v1258_v9 = vpop.f32.mrb[52].mxu1  ;;  %v1690_v45 = vadd.f32 %v1689_v36, %v1688_v40  ;;  %v1588_v34 = vsel %vm277_vm2, %v1372_v6, 0.0 }
 0x167   : > { %1533 = vst.msk [vmem:[%s2613_s29 + $0x5c] sm:$0xf] %vm1509_vm3, %v2034_v5  ;;  %v2142_v51 = vadd.f32 %v2141_v16, %v2140_v12  ;;  %v1260_v22 = vpop.f32.mrb[53].mxu1  ;;  %v1259_v1 = vadd.f32 %v2139_v14, %v1258_v9  ;;  %v1691_v60 = vsel %vm277_vm2, %v1637_v37, 0.0  ;;  %v1589_v17 = vadd.f32 %v1588_v34, %v1587_v42 }
 0x168   : > { %v1261_v39 = vpop.f32.mrb[54].mxu1  ;;  %v1692_v30 = vadd.f32 %v1691_v60, %v1690_v45 }
 0x169   : > { %v1262_v28 = vadd.f32 %v2142_v51, %v1261_v39  ;;  %v1263_v55 = vpop.f32.mrb[55].mxu1  ;;  %v1307_v32 = vadd.f32 %v1259_v1, %v336_v21 }
 0x16a   : > { %v1373_v29 = vld [vmem:[#allocation2 + $0xc0] sm:$0xff] }
 0x16b   : > { %v1308_v57 = vadd.f32 %v1262_v28, %v337_v26  ;;  %v2143_v59 = vpop.f32.mrb[56].mxu0  ;;  %v2035_v38 = vpack.c.bf16 %v1373_v29, %v1373_v29  ;;  %1340 = vst.msk [vmem:[#allocation2 + $0xd0] sm:$0xff] %vm277_vm2, %v1307_v32  ;;  %v1638_v15 = vmul.f32 %v1373_v29, %v1373_v29  ;;  %v1590_v53 = vsel %vm277_vm2, %v1373_v29, 0.0 }
 0x16c   : > { %v1374_v27 = vld [vmem:[#allocation2 + $0xc8] sm:$0xff]  ;;  %v2144_v41 = vpop.f32.mrb[57].mxu0  ;;  %v1591_v3 = vadd.f32 %v1590_v53, %v1589_v17 }
 0x16d   : > { %v2036_v43 = vpack.c.bf16 %v1374_v27, %v1374_v27  ;;  %1341 = vst.msk [vmem:[#allocation2 + $0xd8] sm:$0xff] %vm277_vm2, %v1308_v57  ;;  %v2146_v44 = vpop.f32.mrb[58].mxu0  ;;  %v2145_v46 = vadd.f32 %v2144_v41, %v2143_v59  ;;  %v1693_v61 = vsel %vm277_vm2, %v1638_v15, 0.0  ;;  %v1639_v62 = vmul.f32 %v1374_v27, %v1374_v27 }
 0x16e   : > { %1534 = vst.msk [vmem:[%s2613_s29 + $0x60] sm:$0xf] %vm1509_vm3, %v2035_v38  ;;  %v2147_v47 = vpop.f32.mrb[59].mxu0  ;;  %v1266_v48 = vpop.f32.mrb[56].mxu1  ;;  %v1694_v6 = vadd.f32 %v1693_v61, %v1692_v30  ;;  %v1592_v7 = vsel %vm277_vm2, %v1374_v27, 0.0 }
 0x16f   : > { %1535 = vst.msk [vmem:[%s2613_s29 + $0x64] sm:$0xf] %vm1509_vm3, %v2036_v43  ;;  %v2148_v49 = vadd.f32 %v2147_v47, %v2146_v44  ;;  %v1268_v52 = vpop.f32.mrb[57].mxu1  ;;  %v1267_v54 = vadd.f32 %v2145_v46, %v1266_v48  ;;  %v1695_v12 = vsel %vm277_vm2, %v1639_v62, 0.0  ;;  %v1593_v51 = vadd.f32 %v1592_v7, %v1591_v3 }
 0x170   : > { %v1269_v19 = vpop.f32.mrb[58].mxu1  ;;  %v1696_v26 = vadd.f32 %v1695_v12, %v1694_v6 }
 0x171   : > { %v1270_v0 = vadd.f32 %v2148_v49, %v1269_v19  ;;  %v1271_v35 = vpop.f32.mrb[59].mxu1  ;;  %v1309_v2 = vadd.f32 %v1267_v54, %v338_v50 }
 0x172   : > { %v1375_v4 = vld [vmem:[#allocation2 + $0xd0] sm:$0xff] }
 0x173   : > { %v1310_v23 = vadd.f32 %v1270_v0, %v339_v56  ;;  %v2149_v58 = vpop.f32.mrb[60].mxu0  ;;  %v2037_v8 = vpack.c.bf16 %v1375_v4, %v1375_v4  ;;  %v1640_v10 = vmul.f32 %v1375_v4, %v1375_v4  ;;  %1342 = vst.msk [vmem:[#allocation2 + $0xe0] sm:$0xff] %vm277_vm2, %v1309_v2  ;;  %v1594_v16 = vsel %vm277_vm2, %v1375_v4, 0.0 }
 0x174   : > { %v1376_v11 = vld [vmem:[#allocation2 + $0xd8] sm:$0xff]  ;;  %v2150_v5 = vpop.f32.mrb[61].mxu0  ;;  %v1595_v55 = vadd.f32 %v1594_v16, %v1593_v51 }
 0x175   : > { %v2038_v13 = vpack.c.bf16 %v1376_v11, %v1376_v11  ;;  %1343 = vst.msk [vmem:[#allocation2 + $0xe8] sm:$0xff] %vm277_vm2, %v1310_v23  ;;  %v2152_v14 = vpop.f32.mrb[62].mxu0  ;;  %v2151_v9 = vadd.f32 %v2150_v5, %v2149_v58  ;;  %v1697_v21 = vsel %vm277_vm2, %v1640_v10, 0.0  ;;  %v1641_v22 = vmul.f32 %v1376_v11, %v1376_v11 }
 0x176   : > { %1536 = vst.msk [vmem:[%s2613_s29 + $0x68] sm:$0xf] %vm1509_vm3, %v2037_v8  ;;  %v2153_v18 = vpop.f32.mrb[63].mxu0  ;;  %v1274_v20 = vpop.f32.mrb[60].mxu1  ;;  %v1698_v33 = vadd.f32 %v1697_v21, %v1696_v26  ;;  %v1596_v36 = vsel %vm277_vm2, %v1376_v11, 0.0 }
 0x177   : > { %1537 = vst.msk [vmem:[%s2613_s29 + $0x6c] sm:$0xf] %vm1509_vm3, %v2038_v13  ;;  %v2154_v24 = vadd.f32 %v2153_v18, %v2152_v14  ;;  %v1276_v1 = vpop.f32.mrb[61].mxu1  ;;  %v1275_v39 = vadd.f32 %v2151_v9, %v1274_v20  ;;  %v1699_v29 = vsel %vm277_vm2, %v1641_v22, 0.0  ;;  %v1597_v42 = vadd.f32 %v1596_v36, %v1595_v55 }
 0x178   : > { %v1277_v28 = vpop.f32.mrb[62].mxu1  ;;  %v1700_v44 = vadd.f32 %v1699_v29, %v1698_v33 }
 0x179   : > { %v1278_v31 = vadd.f32 %v2154_v24, %v1277_v28  ;;  %v1279_v32 = vpop.f32.mrb[63].mxu1  ;;  %v1311_v37 = vadd.f32 %v1275_v39, %v340_v25 }
 0x17a   : > { %v1377_v57 = vld [vmem:[#allocation2 + $0xe0] sm:$0xff] }
 0x17b   : > { %v1312_v59 = vadd.f32 %v1278_v31, %v341_v63  ;;  %v2039_v40 = vpack.c.bf16 %v1377_v57, %v1377_v57  ;;  %v1598_v38 = vsel %vm277_vm2, %v1377_v57, 0.0  ;;  %v1642_v27 = vmul.f32 %v1377_v57, %v1377_v57  ;;  %1344 = vst.msk [vmem:[#allocation2 + $0xf0] sm:$0xff] %vm277_vm2, %v1311_v37 }
 0x17c   : > { %v1378_v41 = vld [vmem:[#allocation2 + $0xe8] sm:$0xff]  ;;  %v1599_v34 = vadd.f32 %v1598_v38, %v1597_v42 }
 0x17d   : > { %v2040_v15 = vpack.c.bf16 %v1378_v41, %v1378_v41  ;;  %v1643_v43 = vmul.f32 %v1378_v41, %v1378_v41  ;;  %1345 = vst.msk [vmem:[#allocation2 + $0xf8] sm:$0xff] %vm277_vm2, %v1312_v59  ;;  %v1701_v45 = vsel %vm277_vm2, %v1642_v27, 0.0  ;;  %v1600_v47 = vsel %vm277_vm2, %v1378_v41, 0.0 }
 0x17e   : > { %1538 = vst.msk [vmem:[%s2613_s29 + $0x70] sm:$0xf] %vm1509_vm3, %v2039_v40  ;;  %v1702_v46 = vadd.f32 %v1701_v45, %v1700_v44  ;;  %v1601_v60 = vadd.f32 %v1600_v47, %v1599_v34 }
 0x17f   : > { %1539 = vst.msk [vmem:[%s2613_s29 + $0x74] sm:$0xf] %vm1509_vm3, %v2040_v15  ;;  %v1703_v48 = vsel %vm277_vm2, %v1643_v43, 0.0 }
 0x180   : > { %v1704_v50 = vadd.f32 %v1703_v48, %v1702_v46 }
 0x182   : > { %v1379_v49 = vld [vmem:[#allocation2 + $0xf0] sm:$0xff] }
 0x183   : > { %v2041_v52 = vpack.c.bf16 %v1379_v49, %v1379_v49  ;;  %v1602_v53 = vsel %vm277_vm2, %v1379_v49, 0.0  ;;  %v1644_v54 = vmul.f32 %v1379_v49, %v1379_v49 }
 0x184   : > { %v1380_v56 = vld [vmem:[#allocation2 + $0xf8] sm:$0xff]  ;;  %v1603_v19 = vadd.f32 %v1602_v53, %v1601_v60 }
 0x185   : > { %v2042_v17 = vpack.c.bf16 %v1380_v56, %v1380_v56  ;;  %v1604_v61 = vsel %vm277_vm2, %v1380_v56, 0.0  ;;  %v1645_v62 = vmul.f32 %v1380_v56, %v1380_v56  ;;  %1540 = vst.msk [vmem:[%s2613_s29 + $0x78] sm:$0xf] %vm1509_vm3, %v2041_v52  ;;  %v1705_v0 = vsel %vm277_vm2, %v1644_v54, 0.0 }
 0x186   : > { %v1706_v35 = vadd.f32 %v1705_v0, %v1704_v50  ;;  %v1605_v30 = vadd.f32 %v1604_v61, %v1603_v19 }
 0x187   : > { %1541 = vst.msk [vmem:[%s2613_s29 + $0x7c] sm:$0xf] %vm1509_vm3, %v2042_v17  ;;  %v1707_v2 = vsel %vm277_vm2, %v1645_v62, 0.0 }
 0x188   : > { %v1606_v3 = vrot.slane %v1605_v30, 4  ;;  %v1708_v4 = vadd.f32 %v1707_v2, %v1706_v35 }
 0x18a   : > { %v1607_v23 = vadd.f32 %v1606_v3, %v1605_v30  ;;  %v1709_v58 = vrot.slane %v1708_v4, 4 }
 0x18c   : > { %v1608_v6 = vrot.slane %v1607_v23, 2  ;;  %v1710_v7 = vadd.f32 %v1709_v58, %v1708_v4 }
 0x18e   : > { %v1609_v8 = vadd.f32 %v1608_v6, %v1607_v23  ;;  %v1711_v10 = vrot.slane %v1710_v7, 2 }
 0x190   : > { %v1610_v11 = vrot.slane %v1609_v8, 1  ;;  %v1712_v5 = vadd.f32 %v1711_v10, %v1710_v7 }
 0x192   : > { %v1611_v12 = vadd.f32 %v1610_v11, %v1609_v8  ;;  %v1713_v13 = vrot.slane %v1712_v5, 1 }
 0x194   : > { %1613 = vst.msk [vmem:[%s2625_s5] sm:$0x1] %vm1612_vm4, %v1611_v12  ;;  %v1714_v14 = vadd.f32 %v1713_v13, %v1712_v5 }
 0x196   : > { %1715 = vst.msk [vmem:[%s2625_s5 + $0x1] sm:$0x1] %vm1612_vm4, %v1714_v14 }
 0x197 PF: > { %s14_s14 = sadd.s32 1, %s2324_s14   ;;  %s2922_s12 = smov %s2320_s13 }
 0x198   : > { %p11_p6 = scmp.ge.s32.totalorder %s14_s14, 4   ;;  %s2923_s13 = smov %s2925_s15 }
 0x19a   :  { %13 = sbr.rel (!%p11_p6) target bundleno = 2 (0x2), region = 81 }

</bundles_post_ra>
